<compile_context>
chip_gen: v5e
topology: v5e:2x2
jax: 0.10.0
libtpu: 0.0.40
codegen_flags: <defaults>
</compile_context>

<pallas_src>
import functools

import jax
import jax.numpy as jnp
from jax import lax
from jax.experimental import pallas as pl
from jax.experimental.pallas import tpu as pltpu


# ---------------------------------------------------------------------------
# hardware-aware helpers
# ---------------------------------------------------------------------------
@functools.lru_cache(maxsize=None)
def _vmem_limit_bytes():
    """Per-generation scoped-VMEM budget (v5e/v6e: 128 MiB phys, v7x: 64 MiB)."""
    cap = 64 * 1024 * 1024
    try:
        cap = int(getattr(pltpu.get_tpu_info(), "vmem_capacity_bytes", cap))
    except Exception:
        pass
    return int(min(cap * 3 // 4, 112 * 1024 * 1024))


def _cparams(n_grid_axes):
    return pltpu.CompilerParams(
        dimension_semantics=("parallel",) * n_grid_axes,
        vmem_limit_bytes=_vmem_limit_bytes(),
    )


@functools.lru_cache(maxsize=None)
def _single_buffering_supported():
    """Probe (compile-only) whether pipeline_mode=pl.Buffered(1) lowers here."""
    try:
        def k(x_ref, w_ref, o_ref):
            o_ref[...] = x_ref[...] * w_ref[0]

        f = pl.pallas_call(
            k,
            grid=(2,),
            in_specs=[pl.BlockSpec((8, 128), lambda i: (i, 0)),
                      pl.BlockSpec((2, 8, 128), lambda i: (0, 0, 0),
                                   pipeline_mode=pl.Buffered(1))],
            out_specs=pl.BlockSpec((8, 128), lambda i: (i, 0)),
            out_shape=jax.ShapeDtypeStruct((16, 128), jnp.float32),
        )
        jax.jit(f).lower(jax.ShapeDtypeStruct((16, 128), jnp.float32),
                         jax.ShapeDtypeStruct((2, 8, 128), jnp.float32)).compile()
        return True
    except Exception:
        return False


def _const_spec(shape, index_map):
    """BlockSpec for grid-invariant operands; single-buffered when supported."""
    if _single_buffering_supported():
        return pl.BlockSpec(shape, index_map, pipeline_mode=pl.Buffered(1))
    return pl.BlockSpec(shape, index_map)


def _pick_row_tile(rows, cap):
    """Largest 16- (else 8-) multiple divisor of `rows` <= cap; else full rows
    (full-extent blocks always satisfy the (8,128) layout rule)."""
    cap = max(1, min(cap, rows))
    for mult in (16, 8):
        for d in range(cap, mult - 1, -1):
            if rows % d == 0 and d % mult == 0:
                return d
    return rows


def _pick_images_per_step(N, H, bytes_per_image, fixed_bytes, budget, m_target=256):
    """Images per conv grid step: fold batch into the row tile until MXU M hits
    `m_target`, but keep >=2 grid steps (v7x megacore) and stay inside VMEM."""
    divs = [d for d in range(1, N + 1) if N % d == 0]
    ok = [d for d in divs if (d * H) % 8 == 0 or d == N]
    fits = [d for d in ok if fixed_bytes + d * bytes_per_image <= budget] or [min(ok)]
    multi = [d for d in fits if N // d >= 2]
    cand = multi if multi else fits
    hit = [d for d in cand if d * H >= m_target]
    return min(hit) if hit else max(cand)


# ---------------------------------------------------------------------------
# Kernel 1: ConvTranspose2d(kernel=2, stride=2)
#   Rows are (n, h0), lanes (w0, ci); one fused block-diagonal matmul produces
#   lanes (dh, w0, dw, co) so the 2x2 interleave is a free reshape.
# ---------------------------------------------------------------------------
def _upconv2x2_kernel(x_ref, w_ref, b_ref, o_ref):
    a = jnp.dot(x_ref[...], w_ref[...], preferred_element_type=jnp.float32)
    o_ref[...] = (a + b_ref[...]).astype(o_ref.dtype)


def upconv2x2(x2, wt, b, *, W0, Cin, Cout, act_dtype=jnp.bfloat16):
    """x2: (N*H0, W0*Cin). wt: torch layout (Cin, Cout, 2, 2), b: (Cout,).
    Returns (N*H0, 4*W0*Cout) with lanes (dh, w0, dw, co)."""
    rows = x2.shape[0]
    KL = W0 * Cin
    half = W0 * 2 * Cout
    OL = 2 * half

    eye = jnp.eye(W0, dtype=jnp.float32)
    mats = []
    for dh in range(2):
        wdh = jnp.transpose(wt[:, :, dh, :], (0, 2, 1)).reshape(Cin, 2 * Cout)  # (ci,(dw,co))
        mats.append((eye[:, None, :, None] * wdh[None, :, None, :]).reshape(KL, half))
    wcat = jnp.concatenate(mats, axis=1).astype(act_dtype)        # (KL, (dh,w0,dw,co))
    # TODO(synk): block-diagonal weights scale as O(W0^2*Cin*Cout); tile W0 for
    # very wide feature maps (same plan as the conv3x3 W-tiling TODO).
    bias = jnp.tile(b, 2 * 2 * W0).reshape(1, OL).astype(jnp.float32)

    budget = int(_vmem_limit_bytes() * 0.7)
    w_mult = 1 if _single_buffering_supported() else 2
    fixed = KL * OL * 2 * w_mult + OL * 4 * 2
    per_row = (KL + OL) * 2 * 2 + (KL + OL) * 4
    cap = min(1024, max(8, rows // 2), max(8, (budget - fixed) // per_row))
    R = _pick_row_tile(rows, cap)

    return pl.pallas_call(
        _upconv2x2_kernel,
        grid=(rows // R,),
        in_specs=[pl.BlockSpec((R, KL), lambda g: (g, 0)),
                  _const_spec((KL, OL), lambda g: (0, 0)),
                  _const_spec((1, OL), lambda g: (0, 0))],
        out_specs=pl.BlockSpec((R, OL), lambda g: (g, 0)),
        out_shape=jax.ShapeDtypeStruct((rows, OL), act_dtype),
        compiler_params=_cparams(1),
    )(x2.astype(act_dtype), wcat, bias)


# ---------------------------------------------------------------------------
# Kernel 2: 3x3 'same' conv (+bias) with fused partial BatchNorm statistics.
#   Inputs are *unpadded* lane-folded rows (N*H, W*Cin): the kw taps and the
#   W-edge zero pad live in the banded weights; the kh (row) halo is applied
#   in-kernel with pltpu.roll + image-boundary masks on the f32 accumulators.
# ---------------------------------------------------------------------------
def _banded_conv3x3_weights(wt, W, dtype):
    """torch Conv2d weight (Cout, Cin, 3, 3) -> (3, W*Cin, W*Cout) banded mats."""
    Cout, Cin = wt.shape[0], wt.shape[1]
    mats = []
    for kh in range(3):
        m = jnp.zeros((W, Cin, W, Cout), jnp.float32)
        for kw in range(3):
            band = jnp.eye(W, W, k=1 - kw, dtype=jnp.float32)   # in col u = out col w + kw - 1
            tap = jnp.transpose(wt[:, :, kh, kw], (1, 0))        # (Cin, Cout)
            m = m + band[:, None, :, None] * tap[None, :, None, :]
        mats.append(m.reshape(W * Cin, W * Cout))
    # TODO(synk): banded weights scale as O(W^2*Cin*Cout); for W >~ 64 tile W in
    # 64-128 output-column chunks (K <= ~512) -- mandatory earlier on v7x's
    # 64 MiB VMEM -- and for Cin/Cout >~ 128 switch to a per-tap (9 matmul) layout.
    return jnp.stack(mats, axis=0).astype(dtype)


def _conv3x3_bn_stats_kernel(*refs, num_inputs, H):
    n_in = num_inputs
    x_refs = refs[:n_in]
    w_refs = refs[n_in:2 * n_in]
    b_ref = refs[2 * n_in]
    o_ref, stats_ref = refs[2 * n_in + 1], refs[2 * n_in + 2]

    rows, WCo = o_ref.shape                                  # rows = nb * H
    acc = [None, None, None]                                 # one f32 acc per kh
    for idx in range(n_in):
        x = x_refs[idx][...]                                 # (rows, W*Cin_idx) bf16
        w3 = w_refs[idx]
        for kh in range(3):
            r = jnp.dot(x, w3[kh], preferred_element_type=jnp.float32)
            acc[kh] = r if acc[kh] is None else acc[kh] + r
    a0, a1, a2 = acc

    # out[r] = a0[r-1] + a1[r] + a2[r+1], zero across image boundaries (each
    # image occupies H consecutive rows of the tile). roll -> XLU (free slot).
    ridx = lax.broadcasted_iota(jnp.int32, (rows, WCo), 0)
    up = jnp.where(ridx % H == 0, 0.0, pltpu.roll(a0, 1, 0))
    dn = jnp.where(ridx % H == H - 1, 0.0, pltpu.roll(a2, rows - 1, 0))
    out = a1 + up + dn + b_ref[...]
    o_ref[...] = out.astype(o_ref.dtype)

    # Per-tile BN partials per (w, c) lane column: sum and *centered* sum of
    # squared deviations (Chan et al. combine happens in XLA). 8-sublane store.
    s = jnp.sum(out, axis=0, keepdims=True)
    d = out - s * (1.0 / rows)
    m2 = jnp.sum(d * d, axis=0, keepdims=True)
    stats_ref[0] = jnp.concatenate(
        [s, m2, jnp.zeros((6, WCo), jnp.float32)], axis=0)


def conv3x3_bn_stats(inputs_2d, banded_ws, bias, *, N, H, W, Cout,
                     out_dtype=jnp.bfloat16):
    """inputs_2d: list of (N*H, W*Cin_i). Returns raw conv output (N*H, W*Cout)
    (bf16) and per-tile stats (G, 8, W*Cout) with row0 = sum, row1 = M2."""
    n_in = len(inputs_2d)
    WCo = W * Cout
    for x in inputs_2d:
        assert x.shape[0] == N * H

    budget = int(_vmem_limit_bytes() * 0.7)
    w_mult = 1 if _single_buffering_supported() else 2
    fixed = sum(int(w.size) * 2 for w in banded_ws) * w_mult + WCo * 4 * 4 + 8 * WCo * 8
    per_img = (sum(3 * H * x.shape[1] * 2 for x in inputs_2d)   # in dbl-buf + value
               + 4 * H * WCo * 2                                 # out dbl-buf
               + 8 * H * WCo * 4)                                # f32 accumulators
    nb = _pick_images_per_step(N, H, per_img, fixed, budget)
    G = N // nb
    rows_t = nb * H

    in_specs, args = [], []
    for x in inputs_2d:
        in_specs.append(pl.BlockSpec((rows_t, x.shape[1]), lambda g: (g, 0)))
        args.append(x)
    for bw in banded_ws:
        in_specs.append(_const_spec(bw.shape, lambda g: (0, 0, 0)))
        args.append(bw)
    in_specs.append(_const_spec((1, WCo), lambda g: (0, 0)))
    args.append(jnp.tile(bias, W).reshape(1, WCo).astype(jnp.float32))

    out_shape = (jax.ShapeDtypeStruct((N * H, WCo), out_dtype),
                 jax.ShapeDtypeStruct((G, 8, WCo), jnp.float32))
    out_specs = (pl.BlockSpec((rows_t, WCo), lambda g: (g, 0)),
                 pl.BlockSpec((1, 8, WCo), lambda g: (g, 0, 0)))

    kernel = functools.partial(_conv3x3_bn_stats_kernel, num_inputs=n_in, H=H)
    return pl.pallas_call(
        kernel,
        grid=(G,),
        in_specs=in_specs,
        out_specs=out_specs,
        out_shape=out_shape,
        compiler_params=_cparams(1),
    )(*args)


# ---------------------------------------------------------------------------
# Kernel 3: BatchNorm affine (from batch stats) + leaky_relu(0.1)
# ---------------------------------------------------------------------------
def _bn_scale_shift(stats, gamma, beta, *, n_rows, eps=1e-5):
    """Combine per-(tile, w) partial stats (Chan et al.) into BN scale/shift."""
    Cout = gamma.shape[0]
    s = stats[:, 0, :].reshape(-1, Cout)      # (groups, Cout) per-group sums
    m2 = stats[:, 1, :].reshape(-1, Cout)     # per-group centered sum-of-squares
    groups = s.shape[0]
    total = groups * n_rows                   # = N*H*W
    mean_g = s / n_rows
    mean = jnp.sum(s, axis=0) / total
    m2_tot = jnp.sum(m2, axis=0) + n_rows * jnp.sum((mean_g - mean) ** 2, axis=0)
    var = m2_tot / total                      # biased variance (training-mode BN)
    scale = gamma * jax.lax.rsqrt(var + eps)
    shift = beta - mean * scale
    return scale, shift


def _bn_lrelu_kernel(x_ref, sc_ref, sh_ref, o_ref, *, slope):
    # NOTE: stats come from the f32 accumulator but the affine is applied to the
    # bf16-rounded stored conv output (intentional perf tradeoff, ~1e-3 rel).
    y = x_ref[...].astype(jnp.float32) * sc_ref[...] + sh_ref[...]
    o_ref[...] = jnp.where(y > 0.0, y, slope * y).astype(o_ref.dtype)


def bn_lrelu(conv_raw, scale, shift, *, out_dtype, slope=0.1):
    rows, WCo = conv_raw.shape
    obytes = jnp.dtype(out_dtype).itemsize
    budget = int(_vmem_limit_bytes() * 0.7)
    per_row = WCo * (2 * 2 + 2 * obytes + 8)
    cap = min(1024, max(8, rows // 2), max(8, budget // per_row))
    R = _pick_row_tile(rows, cap)
    rep = WCo // scale.shape[0]
    sc = jnp.tile(scale, rep).reshape(1, WCo).astype(jnp.float32)
    sh = jnp.tile(shift, rep).reshape(1, WCo).astype(jnp.float32)
    return pl.pallas_call(
        functools.partial(_bn_lrelu_kernel, slope=slope),
        grid=(rows // R,),
        in_specs=[pl.BlockSpec((R, WCo), lambda g: (g, 0)),
                  _const_spec((1, WCo), lambda g: (0, 0)),
                  _const_spec((1, WCo), lambda g: (0, 0))],
        out_specs=pl.BlockSpec((R, WCo), lambda g: (g, 0)),
        out_shape=jax.ShapeDtypeStruct((rows, WCo), out_dtype),
        compiler_params=_cparams(1),
    )(conv_raw, sc, sh)


# ---------------------------------------------------------------------------
# UpConv module (merge_mode='concat', up_mode='transpose')
# ---------------------------------------------------------------------------
def init_params(key, in_channels, out_channels):
    ks = jax.random.split(key, 10)
    cin, cout = in_channels, out_channels
    return {
        # ConvTranspose2d(cin, cout, 2, 2): weight (cin, cout, 2, 2)
        "upconv_w": 0.1 * jax.random.normal(ks[0], (cin, cout, 2, 2), jnp.float32),
        "upconv_b": 0.1 * jax.random.normal(ks[1], (cout,), jnp.float32),
        # conv1: Conv2d(2*cout, cout, 3, pad=1)
        "conv1_w": 0.1 * jax.random.normal(ks[2], (cout, 2 * cout, 3, 3), jnp.float32),
        "conv1_b": 0.1 * jax.random.normal(ks[3], (cout,), jnp.float32),
        "bn1_g": 1.0 + 0.1 * jax.random.normal(ks[4], (cout,), jnp.float32),
        "bn1_b": 0.1 * jax.random.normal(ks[5], (cout,), jnp.float32),
        # conv2: Conv2d(cout, cout, 3, pad=1)
        "conv2_w": 0.1 * jax.random.normal(ks[6], (cout, cout, 3, 3), jnp.float32),
        "conv2_b": 0.1 * jax.random.normal(ks[7], (cout,), jnp.float32),
        "bn2_g": 1.0 + 0.1 * jax.random.normal(ks[8], (cout,), jnp.float32),
        "bn2_b": 0.1 * jax.random.normal(ks[9], (cout,), jnp.float32),
    }


@jax.jit
def upconv_forward(params, from_down_nchw, from_up_nchw):
    act_dtype = jnp.bfloat16                                   # MXU / stored-activation dtype

    N, Cin, H0, W0 = from_up_nchw.shape
    Cout = params["upconv_b"].shape[0]
    H, W = 2 * H0, 2 * W0

    # NCHW -> NHWC -> lane-folded 2-D (rows = (n, h), lanes = (w, c)).
    up_in = jnp.transpose(from_up_nchw, (0, 2, 3, 1)).reshape(N * H0, W0 * Cin)
    down = jnp.transpose(from_down_nchw, (0, 2, 3, 1))[:, :H, :W, :]   # _crop_and_match
    down2 = down.reshape(N * H, W * Cout).astype(act_dtype)

    # ConvTranspose2d(k=2, s=2); the 2x2 interleave is a free row-major reshape
    # of the fused single-matmul output (lanes (dh, w0, dw, co)).
    up = upconv2x2(up_in, params["upconv_w"], params["upconv_b"],
                   W0=W0, Cin=Cin, Cout=Cout, act_dtype=act_dtype)
    up2 = up.reshape(N * H, W * Cout)

    # conv1 over concat(up, down): concat fused by splitting the conv1 weights;
    # no pad copies anywhere (taps + W edges in banded weights, row halo in-kernel).
    w1 = params["conv1_w"]                                     # (Cout, 2*Cout, 3, 3)
    bw_up = _banded_conv3x3_weights(w1[:, :Cout], W, act_dtype)
    bw_dn = _banded_conv3x3_weights(w1[:, Cout:], W, act_dtype)
    raw1, st1 = conv3x3_bn_stats([up2, down2], [bw_up, bw_dn], params["conv1_b"],
                                 N=N, H=H, W=W, Cout=Cout)
    sc1, sh1 = _bn_scale_shift(st1, params["bn1_g"], params["bn1_b"],
                               n_rows=(N * H) // st1.shape[0])
    h1 = bn_lrelu(raw1, sc1, sh1, out_dtype=act_dtype)

    # conv2 + BN2 + leaky_relu
    bw2 = _banded_conv3x3_weights(params["conv2_w"], W, act_dtype)
    raw2, st2 = conv3x3_bn_stats([h1], [bw2], params["conv2_b"],
                                 N=N, H=H, W=W, Cout=Cout)
    sc2, sh2 = _bn_scale_shift(st2, params["bn2_g"], params["bn2_b"],
                               n_rows=(N * H) // st2.shape[0])
    out = bn_lrelu(raw2, sc2, sh2, out_dtype=jnp.float32)

    # TODO(synk): nn.Dropout(p=0.5) in training mode is stochastic and torch's
    # RNG stream cannot be reproduced; applied as identity (eval-mode dropout).

    out = out.reshape(N, H, W, Cout)
    return jnp.transpose(out, (0, 3, 1, 2))                    # back to NCHW


if __name__ == "__main__":
    key = jax.random.PRNGKey(0)
    kp, kd, ku = jax.random.split(key, 3)

    in_channels, out_channels = 16, 8
    params = init_params(kp, in_channels, out_channels)

    # from_up:   NCHW (2, 16,  8,  8)  -> upsampled to 16x16
    # from_down: NCHW (2,  8, 18, 18)  -> cropped to 16x16 by _crop_and_match
    from_up = jax.random.normal(ku, (2, in_channels, 8, 8), jnp.float32)
    from_down = jax.random.normal(kd, (2, out_channels, 18, 18), jnp.float32)

    out = upconv_forward(params, from_down, from_up)
    out = jax.block_until_ready(out)

    assert out.shape == (2, out_channels, 16, 16), out.shape
    assert jnp.all(jnp.isfinite(out))
    print("KERNEL_OK")
</pallas_src>

<mosaic_0001>
module attributes {stable_mosaic.version = 11 : i64} {
  func.func @_upconv2x2_kernel(%arg0: i32, %arg1: memref<8x128xbf16, #tpu.memory_space<vmem>>, %arg2: memref<128x256xbf16, #tpu.memory_space<vmem>>, %arg3: memref<1x256xf32, #tpu.memory_space<vmem>>, %arg4: memref<8x256xbf16, #tpu.memory_space<vmem>>) attributes {dimension_semantics = [#tpu.dimension_semantics<parallel>], iteration_bounds = array<i64: 2>, scalar_prefetch = 0 : i64, scratch_operands = 0 : i64, tpu.core_type = #tpu.core_type<tc>, window_params = [{transform_indices = @transform_0, window_bounds = array<i64: 8, 128>}, {pipeline_mode = #tpu.pipeline_mode<synchronous>, transform_indices = @transform_1, window_bounds = array<i64: 128, 256>}, {pipeline_mode = #tpu.pipeline_mode<synchronous>, transform_indices = @transform_2, window_bounds = array<i64: 1, 256>}, {transform_indices = @transform_3, window_bounds = array<i64: 8, 256>}]} {
    %c0 = arith.constant 0 : index
    %c0_0 = arith.constant 0 : index
    %0 = vector.load %arg1[%c0, %c0_0] : memref<8x128xbf16, #tpu.memory_space<vmem>>, vector<8x128xbf16>
    %c0_1 = arith.constant 0 : index
    %c0_2 = arith.constant 0 : index
    %1 = vector.load %arg2[%c0_1, %c0_2] : memref<128x256xbf16, #tpu.memory_space<vmem>>, vector<128x256xbf16>
    %cst = arith.constant dense<0.000000e+00> : vector<8x256xf32>
    %2 = tpu.matmul %0, %1, %cst {dimension_numbers = #tpu.dot_dimension_numbers<[1], [0], [0], [1], [0, 0, 1, 1], [], []>} : vector<8x128xbf16>, vector<128x256xbf16>, vector<8x256xf32> -> vector<8x256xf32>
    %c0_3 = arith.constant 0 : index
    %c0_4 = arith.constant 0 : index
    %3 = vector.load %arg3[%c0_3, %c0_4] : memref<1x256xf32, #tpu.memory_space<vmem>>, vector<1x256xf32>
    %4 = vector.broadcast %3 : vector<1x256xf32> to vector<8x256xf32>
    %5 = arith.addf %2, %4 : vector<8x256xf32>
    %6 = arith.truncf %5 : vector<8x256xf32> to vector<8x256xbf16>
    %c0_5 = arith.constant 0 : index
    %c0_6 = arith.constant 0 : index
    %7 = vector.load %arg4[%c0_5, %c0_6] : memref<8x256xbf16, #tpu.memory_space<vmem>>, vector<8x256xbf16>
    tpu.vector_store %arg4[%c0_5, %c0_6], %6 {strides = array<i32>} : memref<8x256xbf16, #tpu.memory_space<vmem>>, vector<8x256xbf16>,
    return
  }
  func.func @transform_0(%arg0: i32) -> (i32, i32) {
    %c0_i32 = arith.constant 0 : i32
    %c0_i32_0 = arith.constant 0 : i32
    return %arg0, %c0_i32 : i32, i32
  }
  func.func @transform_1(%arg0: i32) -> (i32, i32) {
    %c0_i32 = arith.constant 0 : i32
    %c0_i32_0 = arith.constant 0 : i32
    %c0_i32_1 = arith.constant 0 : i32
    return %c0_i32, %c0_i32_0 : i32, i32
  }
  func.func @transform_2(%arg0: i32) -> (i32, i32) {
    %c0_i32 = arith.constant 0 : i32
    %c0_i32_0 = arith.constant 0 : i32
    %c0_i32_1 = arith.constant 0 : i32
    return %c0_i32, %c0_i32_0 : i32, i32
  }
  func.func @transform_3(%arg0: i32) -> (i32, i32) {
    %c0_i32 = arith.constant 0 : i32
    %c0_i32_0 = arith.constant 0 : i32
    return %arg0, %c0_i32 : i32, i32
  }
}

module attributes {stable_mosaic.version = 11 : i64} {
  func.func @_conv3x3_bn_stats_kernel(%arg0: i32, %arg1: memref<16x128xbf16, #tpu.memory_space<vmem>>, %arg2: memref<16x128xbf16, #tpu.memory_space<vmem>>, %arg3: memref<3x128x128xbf16, #tpu.memory_space<vmem>>, %arg4: memref<3x128x128xbf16, #tpu.memory_space<vmem>>, %arg5: memref<1x128xf32, #tpu.memory_space<vmem>>, %arg6: memref<16x128xbf16, #tpu.memory_space<vmem>>, %arg7: memref<1x8x128xf32, #tpu.memory_space<vmem>>) attributes {dimension_semantics = [#tpu.dimension_semantics<parallel>], iteration_bounds = array<i64: 2>, scalar_prefetch = 0 : i64, scratch_operands = 0 : i64, tpu.core_type = #tpu.core_type<tc>, window_params = [{transform_indices = @transform_0, window_bounds = array<i64: 16, 128>}, {transform_indices = @transform_1, window_bounds = array<i64: 16, 128>}, {pipeline_mode = #tpu.pipeline_mode<synchronous>, transform_indices = @transform_2, window_bounds = array<i64: 3, 128, 128>}, {pipeline_mode = #tpu.pipeline_mode<synchronous>, transform_indices = @transform_3, window_bounds = array<i64: 3, 128, 128>}, {pipeline_mode = #tpu.pipeline_mode<synchronous>, transform_indices = @transform_4, window_bounds = array<i64: 1, 128>}, {transform_indices = @transform_5, window_bounds = array<i64: 16, 128>}, {transform_indices = @transform_6, window_bounds = array<i64: 1, 8, 128>}]} {
    %c0 = arith.constant 0 : index
    %c0_0 = arith.constant 0 : index
    %0 = vector.load %arg1[%c0, %c0_0] : memref<16x128xbf16, #tpu.memory_space<vmem>>, vector<16x128xbf16>
    %c0_1 = arith.constant 0 : index
    %c0_2 = arith.constant 0 : index
    %c0_3 = arith.constant 0 : index
    %1 = vector.load %arg3[%c0_1, %c0_2, %c0_3] : memref<3x128x128xbf16, #tpu.memory_space<vmem>>, vector<1x128x128xbf16>
    %2 = vector.shape_cast %1 : vector<1x128x128xbf16> to vector<128x128xbf16>
    %cst = arith.constant dense<0.000000e+00> : vector<16x128xf32>
    %3 = tpu.matmul %0, %2, %cst {dimension_numbers = #tpu.dot_dimension_numbers<[1], [0], [0], [1], [0, 0, 1, 1], [], []>} : vector<16x128xbf16>, vector<128x128xbf16>, vector<16x128xf32> -> vector<16x128xf32>
    %c1 = arith.constant 1 : index
    %c0_4 = arith.constant 0 : index
    %c0_5 = arith.constant 0 : index
    %4 = vector.load %arg3[%c1, %c0_4, %c0_5] : memref<3x128x128xbf16, #tpu.memory_space<vmem>>, vector<1x128x128xbf16>
    %5 = vector.shape_cast %4 : vector<1x128x128xbf16> to vector<128x128xbf16>
    %cst_6 = arith.constant dense<0.000000e+00> : vector<16x128xf32>
    %6 = tpu.matmul %0, %5, %cst_6 {dimension_numbers = #tpu.dot_dimension_numbers<[1], [0], [0], [1], [0, 0, 1, 1], [], []>} : vector<16x128xbf16>, vector<128x128xbf16>, vector<16x128xf32> -> vector<16x128xf32>
    %c2 = arith.constant 2 : index
    %c0_7 = arith.constant 0 : index
    %c0_8 = arith.constant 0 : index
    %7 = vector.load %arg3[%c2, %c0_7, %c0_8] : memref<3x128x128xbf16, #tpu.memory_space<vmem>>, vector<1x128x128xbf16>
    %8 = vector.shape_cast %7 : vector<1x128x128xbf16> to vector<128x128xbf16>
    %cst_9 = arith.constant dense<0.000000e+00> : vector<16x128xf32>
    %9 = tpu.matmul %0, %8, %cst_9 {dimension_numbers = #tpu.dot_dimension_numbers<[1], [0], [0], [1], [0, 0, 1, 1], [], []>} : vector<16x128xbf16>, vector<128x128xbf16>, vector<16x128xf32> -> vector<16x128xf32>
    %c0_10 = arith.constant 0 : index
    %c0_11 = arith.constant 0 : index
    %10 = vector.load %arg2[%c0_10, %c0_11] : memref<16x128xbf16, #tpu.memory_space<vmem>>, vector<16x128xbf16>
    %c0_12 = arith.constant 0 : index
    %c0_13 = arith.constant 0 : index
    %c0_14 = arith.constant 0 : index
    %11 = vector.load %arg4[%c0_12, %c0_13, %c0_14] : memref<3x128x128xbf16, #tpu.memory_space<vmem>>, vector<1x128x128xbf16>
    %12 = vector.shape_cast %11 : vector<1x128x128xbf16> to vector<128x128xbf16>
    %cst_15 = arith.constant dense<0.000000e+00> : vector<16x128xf32>
    %13 = tpu.matmul %10, %12, %cst_15 {dimension_numbers = #tpu.dot_dimension_numbers<[1], [0], [0], [1], [0, 0, 1, 1], [], []>} : vector<16x128xbf16>, vector<128x128xbf16>, vector<16x128xf32> -> vector<16x128xf32>
    %14 = arith.addf %3, %13 : vector<16x128xf32>
    %c1_16 = arith.constant 1 : index
    %c0_17 = arith.constant 0 : index
    %c0_18 = arith.constant 0 : index
    %15 = vector.load %arg4[%c1_16, %c0_17, %c0_18] : memref<3x128x128xbf16, #tpu.memory_space<vmem>>, vector<1x128x128xbf16>
    %16 = vector.shape_cast %15 : vector<1x128x128xbf16> to vector<128x128xbf16>
    %cst_19 = arith.constant dense<0.000000e+00> : vector<16x128xf32>
    %17 = tpu.matmul %10, %16, %cst_19 {dimension_numbers = #tpu.dot_dimension_numbers<[1], [0], [0], [1], [0, 0, 1, 1], [], []>} : vector<16x128xbf16>, vector<128x128xbf16>, vector<16x128xf32> -> vector<16x128xf32>
    %18 = arith.addf %6, %17 : vector<16x128xf32>
    %c2_20 = arith.constant 2 : index
    %c0_21 = arith.constant 0 : index
    %c0_22 = arith.constant 0 : index
    %19 = vector.load %arg4[%c2_20, %c0_21, %c0_22] : memref<3x128x128xbf16, #tpu.memory_space<vmem>>, vector<1x128x128xbf16>
    %20 = vector.shape_cast %19 : vector<1x128x128xbf16> to vector<128x128xbf16>
    %cst_23 = arith.constant dense<0.000000e+00> : vector<16x128xf32>
    %21 = tpu.matmul %10, %20, %cst_23 {dimension_numbers = #tpu.dot_dimension_numbers<[1], [0], [0], [1], [0, 0, 1, 1], [], []>} : vector<16x128xbf16>, vector<128x128xbf16>, vector<16x128xf32> -> vector<16x128xf32>
    %22 = arith.addf %9, %21 : vector<16x128xf32>
    %23 = tpu.iota {dimensions = array<i32: 0>} : vector<16x128xi32>
    %c16_i32 = arith.constant 16 : i32
    %c0_i32 = arith.constant 0 : i32
    %24 = arith.cmpi eq, %c16_i32, %c0_i32 : i32
    %c1_i32 = arith.constant 1 : i32
    %25 = arith.select %24, %c1_i32, %c16_i32 : i32
    %26 = vector.broadcast %25 : i32 to vector<16x128xi32>
    %27 = arith.remsi %23, %26 : vector<16x128xi32>
    %c0_i32_24 = arith.constant 0 : i32
    %28 = vector.broadcast %c0_i32_24 : i32 to vector<16x128xi32>
    %29 = arith.cmpi ne, %27, %28 : vector<16x128xi32>
    %c0_i32_25 = arith.constant 0 : i32
    %30 = vector.broadcast %c0_i32_25 : i32 to vector<16x128xi32>
    %31 = arith.cmpi slt, %27, %30 : vector<16x128xi32>
    %c0_i32_26 = arith.constant 0 : i32
    %32 = arith.cmpi slt, %25, %c0_i32_26 : i32
    %33 = vector.broadcast %32 : i1 to vector<16x128xi1>
    %34 = vector.broadcast %33 : vector<16x128xi1> to vector<16x128xi1>
    %35 = arith.xori %31, %34 : vector<16x128xi1>
    %36 = arith.andi %35, %29 : vector<16x128xi1>
    %37 = vector.broadcast %25 : i32 to vector<16x128xi32>
    %38 = arith.addi %27, %37 : vector<16x128xi32>
    %39 = arith.select %36, %38, %27 : vector<16x128xi1>, vector<16x128xi32>
    %c0_i32_27 = arith.constant 0 : i32
    %40 = vector.broadcast %c0_i32_27 : i32 to vector<16x128xi32>
    %41 = arith.cmpi eq, %39, %40 : vector<16x128xi32>
    %c1_i32_28 = arith.constant 1 : i32
    %42 = tpu.dynamic_rotate %14 by %c1_i32_28 dim 0 : vector<16x128xf32>, i32 -> vector<16x128xf32>
    %cst_29 = arith.constant 0.000000e+00 : f32
    %43 = vector.broadcast %cst_29 : f32 to vector<16x128xf32>
    %44 = arith.select %41, %43, %42 : vector<16x128xi1>, vector<16x128xf32>
    %c16_i32_30 = arith.constant 16 : i32
    %c0_i32_31 = arith.constant 0 : i32
    %45 = arith.cmpi eq, %c16_i32_30, %c0_i32_31 : i32
    %c1_i32_32 = arith.constant 1 : i32
    %46 = arith.select %45, %c1_i32_32, %c16_i32_30 : i32
    %47 = vector.broadcast %46 : i32 to vector<16x128xi32>
    %48 = arith.remsi %23, %47 : vector<16x128xi32>
    %c0_i32_33 = arith.constant 0 : i32
    %49 = vector.broadcast %c0_i32_33 : i32 to vector<16x128xi32>
    %50 = arith.cmpi ne, %48, %49 : vector<16x128xi32>
    %c0_i32_34 = arith.constant 0 : i32
    %51 = vector.broadcast %c0_i32_34 : i32 to vector<16x128xi32>
    %52 = arith.cmpi slt, %48, %51 : vector<16x128xi32>
    %c0_i32_35 = arith.constant 0 : i32
    %53 = arith.cmpi slt, %46, %c0_i32_35 : i32
    %54 = vector.broadcast %53 : i1 to vector<16x128xi1>
    %55 = vector.broadcast %54 : vector<16x128xi1> to vector<16x128xi1>
    %56 = arith.xori %52, %55 : vector<16x128xi1>
    %57 = arith.andi %56, %50 : vector<16x128xi1>
    %58 = vector.broadcast %46 : i32 to vector<16x128xi32>
    %59 = arith.addi %48, %58 : vector<16x128xi32>
    %60 = arith.select %57, %59, %48 : vector<16x128xi1>, vector<16x128xi32>
    %c15_i32 = arith.constant 15 : i32
    %61 = vector.broadcast %c15_i32 : i32 to vector<16x128xi32>
    %62 = arith.cmpi eq, %60, %61 : vector<16x128xi32>
    %c15_i32_36 = arith.constant 15 : i32
    %63 = tpu.dynamic_rotate %22 by %c15_i32_36 dim 0 : vector<16x128xf32>, i32 -> vector<16x128xf32>
    %cst_37 = arith.constant 0.000000e+00 : f32
    %64 = vector.broadcast %cst_37 : f32 to vector<16x128xf32>
    %65 = arith.select %62, %64, %63 : vector<16x128xi1>, vector<16x128xf32>
    %66 = arith.addf %18, %44 : vector<16x128xf32>
    %67 = arith.addf %66, %65 : vector<16x128xf32>
    %c0_38 = arith.constant 0 : index
    %c0_39 = arith.constant 0 : index
    %68 = vector.load %arg5[%c0_38, %c0_39] : memref<1x128xf32, #tpu.memory_space<vmem>>, vector<1x128xf32>
    %69 = vector.broadcast %68 : vector<1x128xf32> to vector<16x128xf32>
    %70 = arith.addf %67, %69 : vector<16x128xf32>
    %71 = arith.truncf %70 : vector<16x128xf32> to vector<16x128xbf16>
    %c0_40 = arith.constant 0 : index
    %c0_41 = arith.constant 0 : index
    %72 = vector.load %arg6[%c0_40, %c0_41] : memref<16x128xbf16, #tpu.memory_space<vmem>>, vector<16x128xbf16>
    tpu.vector_store %arg6[%c0_40, %c0_41], %71 {strides = array<i32>} : memref<16x128xbf16, #tpu.memory_space<vmem>>, vector<16x128xbf16>,
    %cst_42 = arith.constant dense<0.000000e+00> : vector<128xf32>
    %73 = vector.multi_reduction <add>, %70, %cst_42 [0] : vector<16x128xf32> to vector<128xf32>
    %74 = vector.shape_cast %73 : vector<128xf32> to vector<1x128xf32>
    %cst_43 = arith.constant 6.250000e-02 : f32
    %75 = vector.broadcast %cst_43 : f32 to vector<1x128xf32>
    %76 = arith.mulf %74, %75 : vector<1x128xf32>
    %77 = vector.broadcast %76 : vector<1x128xf32> to vector<16x128xf32>
    %78 = arith.subf %70, %77 : vector<16x128xf32>
    %79 = arith.mulf %78, %78 : vector<16x128xf32>
    %cst_44 = arith.constant dense<0.000000e+00> : vector<128xf32>
    %80 = vector.multi_reduction <add>, %79, %cst_44 [0] : vector<16x128xf32> to vector<128xf32>
    %81 = vector.shape_cast %80 : vector<128xf32> to vector<1x128xf32>
    %cst_45 = arith.constant 0.000000e+00 : f32
    %82 = vector.broadcast %cst_45 : f32 to vector<6x128xf32>
    %83 = tpu.concatenate %74, %81, %82 in 0 : vector<1x128xf32>, vector<1x128xf32>, vector<6x128xf32> -> vector<8x128xf32>
    %c0_46 = arith.constant 0 : index
    %c0_47 = arith.constant 0 : index
    %c0_48 = arith.constant 0 : index
    %84 = vector.load %arg7[%c0_46, %c0_47, %c0_48] : memref<1x8x128xf32, #tpu.memory_space<vmem>>, vector<1x8x128xf32>
    %85 = vector.shape_cast %84 : vector<1x8x128xf32> to vector<8x128xf32>
    %86 = vector.shape_cast %83 : vector<8x128xf32> to vector<1x8x128xf32>
    tpu.vector_store %arg7[%c0_46, %c0_47, %c0_48], %86 {strides = array<i32>} : memref<1x8x128xf32, #tpu.memory_space<vmem>>, vector<1x8x128xf32>,
    return
  }
  func.func @transform_0(%arg0: i32) -> (i32, i32) {
    %c0_i32 = arith.constant 0 : i32
    %c0_i32_0 = arith.constant 0 : i32
    return %arg0, %c0_i32 : i32, i32
  }
  func.func @transform_1(%arg0: i32) -> (i32, i32) {
    %c0_i32 = arith.constant 0 : i32
    %c0_i32_0 = arith.constant 0 : i32
    return %arg0, %c0_i32 : i32, i32
  }
  func.func @transform_2(%arg0: i32) -> (i32, i32, i32) {
    %c0_i32 = arith.constant 0 : i32
    %c0_i32_0 = arith.constant 0 : i32
    %c0_i32_1 = arith.constant 0 : i32
    %c0_i32_2 = arith.constant 0 : i32
    return %c0_i32, %c0_i32_0, %c0_i32_1 : i32, i32, i32
  }
  func.func @transform_3(%arg0: i32) -> (i32, i32, i32) {
    %c0_i32 = arith.constant 0 : i32
    %c0_i32_0 = arith.constant 0 : i32
    %c0_i32_1 = arith.constant 0 : i32
    %c0_i32_2 = arith.constant 0 : i32
    return %c0_i32, %c0_i32_0, %c0_i32_1 : i32, i32, i32
  }
  func.func @transform_4(%arg0: i32) -> (i32, i32) {
    %c0_i32 = arith.constant 0 : i32
    %c0_i32_0 = arith.constant 0 : i32
    %c0_i32_1 = arith.constant 0 : i32
    return %c0_i32, %c0_i32_0 : i32, i32
  }
  func.func @transform_5(%arg0: i32) -> (i32, i32) {
    %c0_i32 = arith.constant 0 : i32
    %c0_i32_0 = arith.constant 0 : i32
    return %arg0, %c0_i32 : i32, i32
  }
  func.func @transform_6(%arg0: i32) -> (i32, i32, i32) {
    %c0_i32 = arith.constant 0 : i32
    %c0_i32_0 = arith.constant 0 : i32
    %c0_i32_1 = arith.constant 0 : i32
    return %arg0, %c0_i32, %c0_i32_0 : i32, i32, i32
  }
}

module attributes {stable_mosaic.version = 11 : i64} {
  func.func @_bn_lrelu_kernel(%arg0: i32, %arg1: memref<16x128xbf16, #tpu.memory_space<vmem>>, %arg2: memref<1x128xf32, #tpu.memory_space<vmem>>, %arg3: memref<1x128xf32, #tpu.memory_space<vmem>>, %arg4: memref<16x128xbf16, #tpu.memory_space<vmem>>) attributes {dimension_semantics = [#tpu.dimension_semantics<parallel>], iteration_bounds = array<i64: 2>, scalar_prefetch = 0 : i64, scratch_operands = 0 : i64, tpu.core_type = #tpu.core_type<tc>, window_params = [{transform_indices = @transform_0, window_bounds = array<i64: 16, 128>}, {pipeline_mode = #tpu.pipeline_mode<synchronous>, transform_indices = @transform_1, window_bounds = array<i64: 1, 128>}, {pipeline_mode = #tpu.pipeline_mode<synchronous>, transform_indices = @transform_2, window_bounds = array<i64: 1, 128>}, {transform_indices = @transform_3, window_bounds = array<i64: 16, 128>}]} {
    %c0 = arith.constant 0 : index
    %c0_0 = arith.constant 0 : index
    %0 = vector.load %arg1[%c0, %c0_0] : memref<16x128xbf16, #tpu.memory_space<vmem>>, vector<16x128xbf16>
    %1 = arith.extf %0 : vector<16x128xbf16> to vector<16x128xf32>
    %c0_1 = arith.constant 0 : index
    %c0_2 = arith.constant 0 : index
    %2 = vector.load %arg2[%c0_1, %c0_2] : memref<1x128xf32, #tpu.memory_space<vmem>>, vector<1x128xf32>
    %3 = vector.broadcast %2 : vector<1x128xf32> to vector<16x128xf32>
    %4 = arith.mulf %1, %3 : vector<16x128xf32>
    %c0_3 = arith.constant 0 : index
    %c0_4 = arith.constant 0 : index
    %5 = vector.load %arg3[%c0_3, %c0_4] : memref<1x128xf32, #tpu.memory_space<vmem>>, vector<1x128xf32>
    %6 = vector.broadcast %5 : vector<1x128xf32> to vector<16x128xf32>
    %7 = arith.addf %4, %6 : vector<16x128xf32>
    %cst = arith.constant 0.000000e+00 : f32
    %8 = vector.broadcast %cst : f32 to vector<16x128xf32>
    %9 = arith.cmpf ogt, %7, %8 : vector<16x128xf32>
    %cst_5 = arith.constant 1.000000e-01 : f32
    %10 = vector.broadcast %cst_5 : f32 to vector<16x128xf32>
    %11 = arith.mulf %10, %7 : vector<16x128xf32>
    %12 = arith.select %9, %7, %11 : vector<16x128xi1>, vector<16x128xf32>
    %13 = arith.truncf %12 : vector<16x128xf32> to vector<16x128xbf16>
    %c0_6 = arith.constant 0 : index
    %c0_7 = arith.constant 0 : index
    %14 = vector.load %arg4[%c0_6, %c0_7] : memref<16x128xbf16, #tpu.memory_space<vmem>>, vector<16x128xbf16>
    tpu.vector_store %arg4[%c0_6, %c0_7], %13 {strides = array<i32>} : memref<16x128xbf16, #tpu.memory_space<vmem>>, vector<16x128xbf16>,
    return
  }
  func.func @transform_0(%arg0: i32) -> (i32, i32) {
    %c0_i32 = arith.constant 0 : i32
    %c0_i32_0 = arith.constant 0 : i32
    return %arg0, %c0_i32 : i32, i32
  }
  func.func @transform_1(%arg0: i32) -> (i32, i32) {
    %c0_i32 = arith.constant 0 : i32
    %c0_i32_0 = arith.constant 0 : i32
    %c0_i32_1 = arith.constant 0 : i32
    return %c0_i32, %c0_i32_0 : i32, i32
  }
  func.func @transform_2(%arg0: i32) -> (i32, i32) {
    %c0_i32 = arith.constant 0 : i32
    %c0_i32_0 = arith.constant 0 : i32
    %c0_i32_1 = arith.constant 0 : i32
    return %c0_i32, %c0_i32_0 : i32, i32
  }
  func.func @transform_3(%arg0: i32) -> (i32, i32) {
    %c0_i32 = arith.constant 0 : i32
    %c0_i32_0 = arith.constant 0 : i32
    return %arg0, %c0_i32 : i32, i32
  }
}

module attributes {stable_mosaic.version = 11 : i64} {
  func.func @_conv3x3_bn_stats_kernel(%arg0: i32, %arg1: memref<16x128xbf16, #tpu.memory_space<vmem>>, %arg2: memref<3x128x128xbf16, #tpu.memory_space<vmem>>, %arg3: memref<1x128xf32, #tpu.memory_space<vmem>>, %arg4: memref<16x128xbf16, #tpu.memory_space<vmem>>, %arg5: memref<1x8x128xf32, #tpu.memory_space<vmem>>) attributes {dimension_semantics = [#tpu.dimension_semantics<parallel>], iteration_bounds = array<i64: 2>, scalar_prefetch = 0 : i64, scratch_operands = 0 : i64, tpu.core_type = #tpu.core_type<tc>, window_params = [{transform_indices = @transform_0, window_bounds = array<i64: 16, 128>}, {pipeline_mode = #tpu.pipeline_mode<synchronous>, transform_indices = @transform_1, window_bounds = array<i64: 3, 128, 128>}, {pipeline_mode = #tpu.pipeline_mode<synchronous>, transform_indices = @transform_2, window_bounds = array<i64: 1, 128>}, {transform_indices = @transform_3, window_bounds = array<i64: 16, 128>}, {transform_indices = @transform_4, window_bounds = array<i64: 1, 8, 128>}]} {
    %c0 = arith.constant 0 : index
    %c0_0 = arith.constant 0 : index
    %0 = vector.load %arg1[%c0, %c0_0] : memref<16x128xbf16, #tpu.memory_space<vmem>>, vector<16x128xbf16>
    %c0_1 = arith.constant 0 : index
    %c0_2 = arith.constant 0 : index
    %c0_3 = arith.constant 0 : index
    %1 = vector.load %arg2[%c0_1, %c0_2, %c0_3] : memref<3x128x128xbf16, #tpu.memory_space<vmem>>, vector<1x128x128xbf16>
    %2 = vector.shape_cast %1 : vector<1x128x128xbf16> to vector<128x128xbf16>
    %cst = arith.constant dense<0.000000e+00> : vector<16x128xf32>
    %3 = tpu.matmul %0, %2, %cst {dimension_numbers = #tpu.dot_dimension_numbers<[1], [0], [0], [1], [0, 0, 1, 1], [], []>} : vector<16x128xbf16>, vector<128x128xbf16>, vector<16x128xf32> -> vector<16x128xf32>
    %c1 = arith.constant 1 : index
    %c0_4 = arith.constant 0 : index
    %c0_5 = arith.constant 0 : index
    %4 = vector.load %arg2[%c1, %c0_4, %c0_5] : memref<3x128x128xbf16, #tpu.memory_space<vmem>>, vector<1x128x128xbf16>
    %5 = vector.shape_cast %4 : vector<1x128x128xbf16> to vector<128x128xbf16>
    %cst_6 = arith.constant dense<0.000000e+00> : vector<16x128xf32>
    %6 = tpu.matmul %0, %5, %cst_6 {dimension_numbers = #tpu.dot_dimension_numbers<[1], [0], [0], [1], [0, 0, 1, 1], [], []>} : vector<16x128xbf16>, vector<128x128xbf16>, vector<16x128xf32> -> vector<16x128xf32>
    %c2 = arith.constant 2 : index
    %c0_7 = arith.constant 0 : index
    %c0_8 = arith.constant 0 : index
    %7 = vector.load %arg2[%c2, %c0_7, %c0_8] : memref<3x128x128xbf16, #tpu.memory_space<vmem>>, vector<1x128x128xbf16>
    %8 = vector.shape_cast %7 : vector<1x128x128xbf16> to vector<128x128xbf16>
    %cst_9 = arith.constant dense<0.000000e+00> : vector<16x128xf32>
    %9 = tpu.matmul %0, %8, %cst_9 {dimension_numbers = #tpu.dot_dimension_numbers<[1], [0], [0], [1], [0, 0, 1, 1], [], []>} : vector<16x128xbf16>, vector<128x128xbf16>, vector<16x128xf32> -> vector<16x128xf32>
    %10 = tpu.iota {dimensions = array<i32: 0>} : vector<16x128xi32>
    %c16_i32 = arith.constant 16 : i32
    %c0_i32 = arith.constant 0 : i32
    %11 = arith.cmpi eq, %c16_i32, %c0_i32 : i32
    %c1_i32 = arith.constant 1 : i32
    %12 = arith.select %11, %c1_i32, %c16_i32 : i32
    %13 = vector.broadcast %12 : i32 to vector<16x128xi32>
    %14 = arith.remsi %10, %13 : vector<16x128xi32>
    %c0_i32_10 = arith.constant 0 : i32
    %15 = vector.broadcast %c0_i32_10 : i32 to vector<16x128xi32>
    %16 = arith.cmpi ne, %14, %15 : vector<16x128xi32>
    %c0_i32_11 = arith.constant 0 : i32
    %17 = vector.broadcast %c0_i32_11 : i32 to vector<16x128xi32>
    %18 = arith.cmpi slt, %14, %17 : vector<16x128xi32>
    %c0_i32_12 = arith.constant 0 : i32
    %19 = arith.cmpi slt, %12, %c0_i32_12 : i32
    %20 = vector.broadcast %19 : i1 to vector<16x128xi1>
    %21 = vector.broadcast %20 : vector<16x128xi1> to vector<16x128xi1>
    %22 = arith.xori %18, %21 : vector<16x128xi1>
    %23 = arith.andi %22, %16 : vector<16x128xi1>
    %24 = vector.broadcast %12 : i32 to vector<16x128xi32>
    %25 = arith.addi %14, %24 : vector<16x128xi32>
    %26 = arith.select %23, %25, %14 : vector<16x128xi1>, vector<16x128xi32>
    %c0_i32_13 = arith.constant 0 : i32
    %27 = vector.broadcast %c0_i32_13 : i32 to vector<16x128xi32>
    %28 = arith.cmpi eq, %26, %27 : vector<16x128xi32>
    %c1_i32_14 = arith.constant 1 : i32
    %29 = tpu.dynamic_rotate %3 by %c1_i32_14 dim 0 : vector<16x128xf32>, i32 -> vector<16x128xf32>
    %cst_15 = arith.constant 0.000000e+00 : f32
    %30 = vector.broadcast %cst_15 : f32 to vector<16x128xf32>
    %31 = arith.select %28, %30, %29 : vector<16x128xi1>, vector<16x128xf32>
    %c16_i32_16 = arith.constant 16 : i32
    %c0_i32_17 = arith.constant 0 : i32
    %32 = arith.cmpi eq, %c16_i32_16, %c0_i32_17 : i32
    %c1_i32_18 = arith.constant 1 : i32
    %33 = arith.select %32, %c1_i32_18, %c16_i32_16 : i32
    %34 = vector.broadcast %33 : i32 to vector<16x128xi32>
    %35 = arith.remsi %10, %34 : vector<16x128xi32>
    %c0_i32_19 = arith.constant 0 : i32
    %36 = vector.broadcast %c0_i32_19 : i32 to vector<16x128xi32>
    %37 = arith.cmpi ne, %35, %36 : vector<16x128xi32>
    %c0_i32_20 = arith.constant 0 : i32
    %38 = vector.broadcast %c0_i32_20 : i32 to vector<16x128xi32>
    %39 = arith.cmpi slt, %35, %38 : vector<16x128xi32>
    %c0_i32_21 = arith.constant 0 : i32
    %40 = arith.cmpi slt, %33, %c0_i32_21 : i32
    %41 = vector.broadcast %40 : i1 to vector<16x128xi1>
    %42 = vector.broadcast %41 : vector<16x128xi1> to vector<16x128xi1>
    %43 = arith.xori %39, %42 : vector<16x128xi1>
    %44 = arith.andi %43, %37 : vector<16x128xi1>
    %45 = vector.broadcast %33 : i32 to vector<16x128xi32>
    %46 = arith.addi %35, %45 : vector<16x128xi32>
    %47 = arith.select %44, %46, %35 : vector<16x128xi1>, vector<16x128xi32>
    %c15_i32 = arith.constant 15 : i32
    %48 = vector.broadcast %c15_i32 : i32 to vector<16x128xi32>
    %49 = arith.cmpi eq, %47, %48 : vector<16x128xi32>
    %c15_i32_22 = arith.constant 15 : i32
    %50 = tpu.dynamic_rotate %9 by %c15_i32_22 dim 0 : vector<16x128xf32>, i32 -> vector<16x128xf32>
    %cst_23 = arith.constant 0.000000e+00 : f32
    %51 = vector.broadcast %cst_23 : f32 to vector<16x128xf32>
    %52 = arith.select %49, %51, %50 : vector<16x128xi1>, vector<16x128xf32>
    %53 = arith.addf %6, %31 : vector<16x128xf32>
    %54 = arith.addf %53, %52 : vector<16x128xf32>
    %c0_24 = arith.constant 0 : index
    %c0_25 = arith.constant 0 : index
    %55 = vector.load %arg3[%c0_24, %c0_25] : memref<1x128xf32, #tpu.memory_space<vmem>>, vector<1x128xf32>
    %56 = vector.broadcast %55 : vector<1x128xf32> to vector<16x128xf32>
    %57 = arith.addf %54, %56 : vector<16x128xf32>
    %58 = arith.truncf %57 : vector<16x128xf32> to vector<16x128xbf16>
    %c0_26 = arith.constant 0 : index
    %c0_27 = arith.constant 0 : index
    %59 = vector.load %arg4[%c0_26, %c0_27] : memref<16x128xbf16, #tpu.memory_space<vmem>>, vector<16x128xbf16>
    tpu.vector_store %arg4[%c0_26, %c0_27], %58 {strides = array<i32>} : memref<16x128xbf16, #tpu.memory_space<vmem>>, vector<16x128xbf16>,
    %cst_28 = arith.constant dense<0.000000e+00> : vector<128xf32>
    %60 = vector.multi_reduction <add>, %57, %cst_28 [0] : vector<16x128xf32> to vector<128xf32>
    %61 = vector.shape_cast %60 : vector<128xf32> to vector<1x128xf32>
    %cst_29 = arith.constant 6.250000e-02 : f32
    %62 = vector.broadcast %cst_29 : f32 to vector<1x128xf32>
    %63 = arith.mulf %61, %62 : vector<1x128xf32>
    %64 = vector.broadcast %63 : vector<1x128xf32> to vector<16x128xf32>
    %65 = arith.subf %57, %64 : vector<16x128xf32>
    %66 = arith.mulf %65, %65 : vector<16x128xf32>
    %cst_30 = arith.constant dense<0.000000e+00> : vector<128xf32>
    %67 = vector.multi_reduction <add>, %66, %cst_30 [0] : vector<16x128xf32> to vector<128xf32>
    %68 = vector.shape_cast %67 : vector<128xf32> to vector<1x128xf32>
    %cst_31 = arith.constant 0.000000e+00 : f32
    %69 = vector.broadcast %cst_31 : f32 to vector<6x128xf32>
    %70 = tpu.concatenate %61, %68, %69 in 0 : vector<1x128xf32>, vector<1x128xf32>, vector<6x128xf32> -> vector<8x128xf32>
    %c0_32 = arith.constant 0 : index
    %c0_33 = arith.constant 0 : index
    %c0_34 = arith.constant 0 : index
    %71 = vector.load %arg5[%c0_32, %c0_33, %c0_34] : memref<1x8x128xf32, #tpu.memory_space<vmem>>, vector<1x8x128xf32>
    %72 = vector.shape_cast %71 : vector<1x8x128xf32> to vector<8x128xf32>
    %73 = vector.shape_cast %70 : vector<8x128xf32> to vector<1x8x128xf32>
    tpu.vector_store %arg5[%c0_32, %c0_33, %c0_34], %73 {strides = array<i32>} : memref<1x8x128xf32, #tpu.memory_space<vmem>>, vector<1x8x128xf32>,
    return
  }
  func.func @transform_0(%arg0: i32) -> (i32, i32) {
    %c0_i32 = arith.constant 0 : i32
    %c0_i32_0 = arith.constant 0 : i32
    return %arg0, %c0_i32 : i32, i32
  }
  func.func @transform_1(%arg0: i32) -> (i32, i32, i32) {
    %c0_i32 = arith.constant 0 : i32
    %c0_i32_0 = arith.constant 0 : i32
    %c0_i32_1 = arith.constant 0 : i32
    %c0_i32_2 = arith.constant 0 : i32
    return %c0_i32, %c0_i32_0, %c0_i32_1 : i32, i32, i32
  }
  func.func @transform_2(%arg0: i32) -> (i32, i32) {
    %c0_i32 = arith.constant 0 : i32
    %c0_i32_0 = arith.constant 0 : i32
    %c0_i32_1 = arith.constant 0 : i32
    return %c0_i32, %c0_i32_0 : i32, i32
  }
  func.func @transform_3(%arg0: i32) -> (i32, i32) {
    %c0_i32 = arith.constant 0 : i32
    %c0_i32_0 = arith.constant 0 : i32
    return %arg0, %c0_i32 : i32, i32
  }
  func.func @transform_4(%arg0: i32) -> (i32, i32, i32) {
    %c0_i32 = arith.constant 0 : i32
    %c0_i32_0 = arith.constant 0 : i32
    %c0_i32_1 = arith.constant 0 : i32
    return %arg0, %c0_i32, %c0_i32_0 : i32, i32, i32
  }
}

module attributes {stable_mosaic.version = 11 : i64} {
  func.func @_bn_lrelu_kernel(%arg0: i32, %arg1: memref<16x128xbf16, #tpu.memory_space<vmem>>, %arg2: memref<1x128xf32, #tpu.memory_space<vmem>>, %arg3: memref<1x128xf32, #tpu.memory_space<vmem>>, %arg4: memref<16x128xf32, #tpu.memory_space<vmem>>) attributes {dimension_semantics = [#tpu.dimension_semantics<parallel>], iteration_bounds = array<i64: 2>, scalar_prefetch = 0 : i64, scratch_operands = 0 : i64, tpu.core_type = #tpu.core_type<tc>, window_params = [{transform_indices = @transform_0, window_bounds = array<i64: 16, 128>}, {pipeline_mode = #tpu.pipeline_mode<synchronous>, transform_indices = @transform_1, window_bounds = array<i64: 1, 128>}, {pipeline_mode = #tpu.pipeline_mode<synchronous>, transform_indices = @transform_2, window_bounds = array<i64: 1, 128>}, {transform_indices = @transform_3, window_bounds = array<i64: 16, 128>}]} {
    %c0 = arith.constant 0 : index
    %c0_0 = arith.constant 0 : index
    %0 = vector.load %arg1[%c0, %c0_0] : memref<16x128xbf16, #tpu.memory_space<vmem>>, vector<16x128xbf16>
    %1 = arith.extf %0 : vector<16x128xbf16> to vector<16x128xf32>
    %c0_1 = arith.constant 0 : index
    %c0_2 = arith.constant 0 : index
    %2 = vector.load %arg2[%c0_1, %c0_2] : memref<1x128xf32, #tpu.memory_space<vmem>>, vector<1x128xf32>
    %3 = vector.broadcast %2 : vector<1x128xf32> to vector<16x128xf32>
    %4 = arith.mulf %1, %3 : vector<16x128xf32>
    %c0_3 = arith.constant 0 : index
    %c0_4 = arith.constant 0 : index
    %5 = vector.load %arg3[%c0_3, %c0_4] : memref<1x128xf32, #tpu.memory_space<vmem>>, vector<1x128xf32>
    %6 = vector.broadcast %5 : vector<1x128xf32> to vector<16x128xf32>
    %7 = arith.addf %4, %6 : vector<16x128xf32>
    %cst = arith.constant 0.000000e+00 : f32
    %8 = vector.broadcast %cst : f32 to vector<16x128xf32>
    %9 = arith.cmpf ogt, %7, %8 : vector<16x128xf32>
    %cst_5 = arith.constant 1.000000e-01 : f32
    %10 = vector.broadcast %cst_5 : f32 to vector<16x128xf32>
    %11 = arith.mulf %10, %7 : vector<16x128xf32>
    %12 = arith.select %9, %7, %11 : vector<16x128xi1>, vector<16x128xf32>
    %c0_6 = arith.constant 0 : index
    %c0_7 = arith.constant 0 : index
    %13 = vector.load %arg4[%c0_6, %c0_7] : memref<16x128xf32, #tpu.memory_space<vmem>>, vector<16x128xf32>
    tpu.vector_store %arg4[%c0_6, %c0_7], %12 {strides = array<i32>} : memref<16x128xf32, #tpu.memory_space<vmem>>, vector<16x128xf32>,
    return
  }
  func.func @transform_0(%arg0: i32) -> (i32, i32) {
    %c0_i32 = arith.constant 0 : i32
    %c0_i32_0 = arith.constant 0 : i32
    return %arg0, %c0_i32 : i32, i32
  }
  func.func @transform_1(%arg0: i32) -> (i32, i32) {
    %c0_i32 = arith.constant 0 : i32
    %c0_i32_0 = arith.constant 0 : i32
    %c0_i32_1 = arith.constant 0 : i32
    return %c0_i32, %c0_i32_0 : i32, i32
  }
  func.func @transform_2(%arg0: i32) -> (i32, i32) {
    %c0_i32 = arith.constant 0 : i32
    %c0_i32_0 = arith.constant 0 : i32
    %c0_i32_1 = arith.constant 0 : i32
    return %c0_i32, %c0_i32_0 : i32, i32
  }
  func.func @transform_3(%arg0: i32) -> (i32, i32) {
    %c0_i32 = arith.constant 0 : i32
    %c0_i32_0 = arith.constant 0 : i32
    return %arg0, %c0_i32 : i32, i32
  }
}

</mosaic_0001>

<bundles_post_ra>
// kernel: tile.43
= control target key start
LH: loop header
LB: loop body
LE: loop exit
PB: predicated region body
PF: predicated region fallthrough
CT: control target
= control target key end

     0   :  { %s28_s0 = inlined_call_operand.vmem [shape: f32[8], index: 0, kind: input, shape index: {}]   ;;  %s29_s1 = inlined_call_operand.vmem [shape: f32[16,8], index: 1, kind: output, shape index: {}]  }
   0x1   :  { %v4_v0 = vld [vmem:[%s28_s0] ss:$0 sm:$0xff] }
   0x2   :  { %5 = vst [vmem:[%s29_s1] sm:$0xff] %v4_v0 }
   0x3   :  { %8 = vst [vmem:[%s29_s1 + $0x8] sm:$0xff] %v4_v0 }

// kernel: tile.44
= control target key start
LH: loop header
LB: loop body
LE: loop exit
PB: predicated region body
PF: predicated region fallthrough
CT: control target
= control target key end

     0   :  { %s131_s10 = smov 120   ;;  %s132_s11 = smov 104   ;;  %vm3_vm0 = vcmask 64512   ;;  %vm9_vm1 = vcmask 1048512   ;;  %vm15_vm2 = vcmask 982912   ;;  %vm21_vm3 = vcmask 917312   ;;  %s207_s0 = inlined_call_operand.vmem [shape: f32[16,8], index: 0, kind: input, shape index: {}]   ;;  %s208_s1 = inlined_call_operand.vmem [shape: f32[1,128], index: 1, kind: output, shape index: {}]  }
   0x1   :  { %v101_v0 = vld [vmem:[%s207_s0 + $0xf] sm:$0x1]   ;;  %v103_v1 = vld [vmem:[%s207_s0 + $0xd] sm:$0x1]   ;;  %v105_v2 = vld [vmem:[%s207_s0 + $0xb] sm:$0x1]  }
   0x2   :  { %7 = vrot.lane.b32.xlu0 %v101_v0, %s131_s10  ;;  %19 = vrot.lane.b32.xlu1 %v103_v1, %s132_s11  ;;  %s133_s14 = smov 88   ;;  %v102_v3 = vld [vmem:[%s207_s0 + $0xe] sm:$0x1]   ;;  %v104_v4 = vld [vmem:[%s207_s0 + $0xc] sm:$0x1]   ;;  %s134_s19 = smov 112  }
   0x3   :  { %31 = vrot.lane.b32.xlu2 %v105_v2, %s133_s14  ;;  %s135_s20 = smov 96   ;;  %v106_v5 = vld [vmem:[%s207_s0 + $0xa] sm:$0x1]   ;;  %s136_s23 = smov 80   ;;  %v107_v6 = vld [vmem:[%s207_s0 + $0x9] sm:$0x1]  }
   0x4   :  { %v108_v7 = vld [vmem:[%s207_s0 + $0x8] sm:$0x1]   ;;  %s137_s28 = smov 72   ;;  %s138_s29 = smov 64   ;;  %v109_v8 = vld [vmem:[%s207_s0 + $0x7] sm:$0x1]  }
   0x5   :  { %s139_s3 = smov 56   ;;  %v110_v9 = vld [vmem:[%s207_s0 + $0x6] sm:$0x1]   ;;  %v111_v10 = vld [vmem:[%s207_s0 + $0x5] sm:$0x1]   ;;  %s140_s8 = smov 48  }
   0x6   :  { %s141_s9 = smov 40   ;;  %v112_v11 = vld [vmem:[%s207_s0 + $0x4] sm:$0x1]   ;;  %s142_s12 = smov 32   ;;  %v113_v12 = vld [vmem:[%s207_s0 + $0x3] sm:$0x1]  }
   0x7   :  { %v114_v13 = vld [vmem:[%s207_s0 + $0x2] sm:$0x1]   ;;  %s143_s17 = smov 24   ;;  %s144_s18 = smov 16   ;;  %v115_v14 = vld [vmem:[%s207_s0 + $0x1] sm:$0x1]  }
   0x8   :  { %s145_s21 = smov 8   ;;  %v2_v15 = vld [vmem:[%s207_s0] sm:$0x1]   ;;  %vm27_vm4 = vcmask 851712   ;;  %vm33_vm5 = vcmask 786112   ;;  %vm39_vm6 = vcmask 720512  }
   0x9   :  { %4 = vst.msk [vmem:[#allocation0] sm:$0x1] %vm3_vm0, %v2_v15   ;;  %vm45_vm7 = vcmask 654912   ;;  %vm51_vm8 = vcmask 589312   ;;  %vm57_vm9 = vcmask 523712   ;;  %vm63_vm10 = vcmask 458112  }
   0xa   :  { %13 = vrot.lane.b32.xlu0 %v102_v3, %s134_s19  ;;  %25 = vrot.lane.b32.xlu1 %v104_v4, %s135_s20  ;;  %vm69_vm11 = vcmask 392512   ;;  %vm75_vm12 = vcmask 326912   ;;  %vm81_vm13 = vcmask 261312   ;;  %vm87_vm14 = vcmask 195712  }
   0xb   :  { %37 = vrot.lane.b32.xlu2 %v106_v5, %s136_s23  ;;  %vm93_vm15 = vcmask 130112  }
  0x12   :  { %43 = vrot.lane.b32.xlu0 %v107_v6, %s137_s28  ;;  %49 = vrot.lane.b32.xlu1 %v108_v7, %s138_s29 }
  0x13   :  { %55 = vrot.lane.b32.xlu2 %v109_v8, %s139_s3 }
  0x1a   :  { %61 = vrot.lane.b32.xlu0 %v110_v9, %s140_s8  ;;  %67 = vrot.lane.b32.xlu1 %v111_v10, %s141_s9 }
  0x1b   :  { %73 = vrot.lane.b32.xlu2 %v112_v11, %s142_s12 }
  0x22   :  { %79 = vrot.lane.b32.xlu0 %v113_v12, %s143_s17  ;;  %85 = vrot.lane.b32.xlu1 %v114_v13, %s144_s18 }
  0x23   :  { %91 = vrot.lane.b32.xlu2 %v115_v14, %s145_s21 }
  0x5d   :  { %v32_v16 = vpop.permute.xlu2 %31  }
  0x65   :  { %v38_v17 = vpop.permute.xlu2 %37  }
  0x6d   :  { %v56_v18 = vpop.permute.xlu2 %55  }
  0x74   :  { %v8_v19 = vpop.permute.xlu0 %7   ;;  %v20_v20 = vpop.permute.xlu1 %19  }
  0x75   :  { %10 = vst.msk [vmem:[#allocation0] sm:$0x1] %vm9_vm1, %v8_v19   ;;  %v74_v21 = vpop.permute.xlu2 %73  }
  0x7c   :  { %v14_v22 = vpop.permute.xlu0 %13   ;;  %v26_v23 = vpop.permute.xlu1 %25  }
  0x7d   :  { %16 = vst.msk [vmem:[#allocation0] sm:$0x1] %vm15_vm2, %v14_v22   ;;  %v92_v24 = vpop.permute.xlu2 %91  }
  0x7e   :  { %22 = vst.msk [vmem:[#allocation0] sm:$0x1] %vm21_vm3, %v20_v20  }
  0x7f   :  { %28 = vst.msk [vmem:[#allocation0] sm:$0x1] %vm27_vm4, %v26_v23  }
  0x80   :  { %34 = vst.msk [vmem:[#allocation0] sm:$0x1] %vm33_vm5, %v32_v16  }
  0x81   :  { %40 = vst.msk [vmem:[#allocation0] sm:$0x1] %vm39_vm6, %v38_v17  }
  0x84   :  { %v44_v25 = vpop.permute.xlu0 %43   ;;  %v50_v26 = vpop.permute.xlu1 %49  }
  0x85   :  { %46 = vst.msk [vmem:[#allocation0] sm:$0x1] %vm45_vm7, %v44_v25  }
  0x86   :  { %52 = vst.msk [vmem:[#allocation0] sm:$0x1] %vm51_vm8, %v50_v26  }
  0x87   :  { %58 = vst.msk [vmem:[#allocation0] sm:$0x1] %vm57_vm9, %v56_v18  }
  0x8c   :  { %v62_v27 = vpop.permute.xlu0 %61   ;;  %v68_v28 = vpop.permute.xlu1 %67  }
  0x8d   :  { %64 = vst.msk [vmem:[#allocation0] sm:$0x1] %vm63_vm10, %v62_v27  }
  0x8e   :  { %70 = vst.msk [vmem:[#allocation0] sm:$0x1] %vm69_vm11, %v68_v28  }
  0x8f   :  { %76 = vst.msk [vmem:[#allocation0] sm:$0x1] %vm75_vm12, %v74_v21  }
  0x94   :  { %v80_v29 = vpop.permute.xlu0 %79   ;;  %v86_v30 = vpop.permute.xlu1 %85  }
  0x95   :  { %82 = vst.msk [vmem:[#allocation0] sm:$0x1] %vm81_vm13, %v80_v29  }
  0x96   :  { %88 = vst.msk [vmem:[#allocation0] sm:$0x1] %vm87_vm14, %v86_v30  }
  0x97   :  { %94 = vst.msk [vmem:[#allocation0] sm:$0x1] %vm93_vm15, %v92_v24  }
  0x9e   :  { %v97_v31 = vld [vmem:[#allocation0] sm:$0x1] }
  0x9f   :  { %100 = vst [vmem:[%s208_s1] sm:$0x1] %v97_v31 }

// kernel: tile.38
= control target key start
LH: loop header
LB: loop body
LE: loop exit
PB: predicated region body
PF: predicated region fallthrough
CT: control target
= control target key end

     0   :  { %s40_s0 = inlined_call_operand.vmem [shape: f32[8], index: 0, kind: input, shape index: {}]   ;;  %s41_s1 = inlined_call_operand.vmem [shape: f32[32,8], index: 1, kind: output, shape index: {}]  }
   0x1   :  { %v4_v0 = vld [vmem:[%s40_s0] ss:$0 sm:$0xff] }
   0x2   :  { %5 = vst [vmem:[%s41_s1] sm:$0xff] %v4_v0 }
   0x3   :  { %12 = vst [vmem:[%s41_s1 + $0x8] sm:$0xff] %v4_v0 }
   0x4   :  { %13 = vst [vmem:[%s41_s1 + $0x10] sm:$0xff] %v4_v0 }
   0x5   :  { %14 = vst [vmem:[%s41_s1 + $0x18] sm:$0xff] %v4_v0 }

// kernel: tile.39
= control target key start
LH: loop header
LB: loop body
LE: loop exit
PB: predicated region body
PF: predicated region fallthrough
CT: control target
= control target key end

     0   :  { %s7_s6 = smov 3  ;;  %s21_s9 = smov 3  ;;  %vm4_vm0 = vcmask 64512   ;;  %vm11_vm1 = vcmask 1048512   ;;  %vm18_vm2 = vcmask 982912   ;;  %vm25_vm3 = vcmask 917312   ;;  %s233_s0 = inlined_call_operand.vmem [shape: f32[32,8], index: 0, kind: input, shape index: {}]   ;;  %s234_s1 = inlined_call_operand.vmem [shape: f32[1,256], index: 1, kind: output, shape index: {}]  }
   0x1   :  { %v123_v0 = vld [vmem:[%s233_s0 + $0xf] ss:$16 sm:%s7_s6]   ;;  %s154_s10 = smov 120   ;;  %v125_v1 = vld [vmem:[%s233_s0 + $0xd] ss:$16 sm:%s21_s9]   ;;  %s155_s13 = smov 104  }
   0x2   :  { %9 = vrot.lane.b32.xlu0 %v123_v0, %s154_s10  ;;  %23 = vrot.lane.b32.xlu1 %v125_v1, %s155_s13  ;;  %s14_s14 = smov 3  ;;  %s28_s15 = smov 3  ;;  %vm32_vm4 = vcmask 851712   ;;  %vm39_vm5 = vcmask 786112   ;;  %vm46_vm6 = vcmask 720512   ;;  %vm53_vm7 = vcmask 654912  }
   0x3   :  { %v124_v2 = vld [vmem:[%s233_s0 + $0xe] ss:$16 sm:%s14_s14]   ;;  %v126_v3 = vld [vmem:[%s233_s0 + $0xc] ss:$16 sm:%s28_s15]   ;;  %s35_s20 = smov 3  ;;  %s156_s23 = smov 112  }
   0x4   :  { %v127_v4 = vld [vmem:[%s233_s0 + $0xb] ss:$16 sm:%s35_s20]   ;;  %s157_s24 = smov 88   ;;  %s158_s25 = smov 96   ;;  %vm60_vm8 = vcmask 589312   ;;  %vm67_vm9 = vcmask 523712  }
   0x5   :  { %37 = vrot.lane.b32.xlu2 %v127_v4, %s157_s24  ;;  %s49_s26 = smov 3  ;;  %s42_s27 = smov 3  ;;  %vm74_vm10 = vcmask 458112   ;;  %vm81_vm11 = vcmask 392512   ;;  %vm88_vm12 = vcmask 326912   ;;  %vm95_vm13 = vcmask 261312  }
   0x6   :  { %s56_s28 = smov 3  ;;  %v129_v5 = vld [vmem:[%s233_s0 + $0x9] ss:$16 sm:%s49_s26]   ;;  %v128_v6 = vld [vmem:[%s233_s0 + $0xa] ss:$16 sm:%s42_s27]   ;;  %s159_s6 = smov 72  }
   0x7   :  { %v130_v7 = vld [vmem:[%s233_s0 + $0x8] ss:$16 sm:%s56_s28]   ;;  %s160_s7 = smov 80   ;;  %s161_s8 = smov 64   ;;  %vm102_vm14 = vcmask 195712   ;;  %vm109_vm15 = vcmask 130112  }
   0x8   :  { %s70_s9 = smov 3  ;;  %s63_s10 = smov 3 }
   0x9   :  { %s77_s11 = smov 3  ;;  %v132_v8 = vld [vmem:[%s233_s0 + $0x6] ss:$16 sm:%s70_s9]   ;;  %v131_v9 = vld [vmem:[%s233_s0 + $0x7] ss:$16 sm:%s63_s10]   ;;  %s162_s18 = smov 48  }
   0xa   :  { %16 = vrot.lane.b32.xlu0 %v124_v2, %s156_s23  ;;  %30 = vrot.lane.b32.xlu1 %v126_v3, %s158_s25  ;;  %v133_v10 = vld [vmem:[%s233_s0 + $0x5] ss:$16 sm:%s77_s11]   ;;  %s163_s19 = smov 56   ;;  %s164_s20 = smov 40  }
   0xb   :  { %s91_s21 = smov 3  ;;  %s84_s22 = smov 3 }
   0xc   :  { %s98_s23 = smov 3  ;;  %v135_v11 = vld [vmem:[%s233_s0 + $0x3] ss:$16 sm:%s91_s21]   ;;  %v134_v12 = vld [vmem:[%s233_s0 + $0x4] ss:$16 sm:%s84_s22]   ;;  %s165_s30 = smov 24  }
   0xd   :  { %44 = vrot.lane.b32.xlu2 %v128_v6, %s160_s7  ;;  %v136_v13 = vld [vmem:[%s233_s0 + $0x2] ss:$16 sm:%s98_s23]   ;;  %s166_s2 = smov 32   ;;  %s167_s3 = smov 16  }
   0xe   :  { %s105_s4 = smov 3  ;;  %s168_s7 = smov 8  }
   0xf   :  { %v137_v14 = vld [vmem:[%s233_s0 + $0x1] ss:$16 sm:%s105_s4]  }
  0x12   :  { %51 = vrot.lane.b32.xlu0 %v129_v5, %s159_s6  ;;  %58 = vrot.lane.b32.xlu1 %v130_v7, %s161_s8  ;;  %s2_s8 = smov 3 }
  0x13   :  { %v3_v15 = vld [vmem:[%s233_s0] ss:$16 sm:%s2_s8]  }
  0x14   :  { %5 = vst.msk [vmem:[#allocation0] ss:$8 sm:$0x3] %vm4_vm0, %v3_v15  }
  0x15   :  { %65 = vrot.lane.b32.xlu2 %v131_v9, %s163_s19 }
  0x1a   :  { %72 = vrot.lane.b32.xlu0 %v132_v8, %s162_s18  ;;  %79 = vrot.lane.b32.xlu1 %v133_v10, %s164_s20 }
  0x1d   :  { %86 = vrot.lane.b32.xlu2 %v134_v12, %s166_s2 }
  0x22   :  { %93 = vrot.lane.b32.xlu0 %v135_v11, %s165_s30  ;;  %100 = vrot.lane.b32.xlu1 %v136_v13, %s167_s3 }
  0x25   :  { %107 = vrot.lane.b32.xlu2 %v137_v14, %s168_s7 }
  0x5f   :  { %v38_v16 = vpop.permute.xlu2 %37  }
  0x67   :  { %v45_v17 = vpop.permute.xlu2 %44  }
  0x6f   :  { %v66_v19 = vpop.permute.xlu2 %65  }
  0x74   :  { %v10_v18 = vpop.permute.xlu0 %9   ;;  %v24_v20 = vpop.permute.xlu1 %23  }
  0x75   :  { %12 = vst.msk [vmem:[#allocation0] ss:$8 sm:$0x3] %vm11_vm1, %v10_v18  }
  0x77   :  { %v87_v22 = vpop.permute.xlu2 %86  }
  0x7c   :  { %v17_v21 = vpop.permute.xlu0 %16   ;;  %v31_v23 = vpop.permute.xlu1 %30  }
  0x7d   :  { %19 = vst.msk [vmem:[#allocation0] ss:$8 sm:$0x3] %vm18_vm2, %v17_v21  }
  0x7e   :  { %26 = vst.msk [vmem:[#allocation0] ss:$8 sm:$0x3] %vm25_vm3, %v24_v20  }
  0x7f   :  { %33 = vst.msk [vmem:[#allocation0] ss:$8 sm:$0x3] %vm32_vm4, %v31_v23   ;;  %v108_v25 = vpop.permute.xlu2 %107  }
  0x80   :  { %40 = vst.msk [vmem:[#allocation0] ss:$8 sm:$0x3] %vm39_vm5, %v38_v16  }
  0x81   :  { %47 = vst.msk [vmem:[#allocation0] ss:$8 sm:$0x3] %vm46_vm6, %v45_v17  }
  0x84   :  { %v52_v24 = vpop.permute.xlu0 %51   ;;  %v59_v26 = vpop.permute.xlu1 %58  }
  0x85   :  { %54 = vst.msk [vmem:[#allocation0] ss:$8 sm:$0x3] %vm53_vm7, %v52_v24  }
  0x86   :  { %61 = vst.msk [vmem:[#allocation0] ss:$8 sm:$0x3] %vm60_vm8, %v59_v26  }
  0x87   :  { %68 = vst.msk [vmem:[#allocation0] ss:$8 sm:$0x3] %vm67_vm9, %v66_v19  }
  0x8c   :  { %v73_v27 = vpop.permute.xlu0 %72   ;;  %v80_v28 = vpop.permute.xlu1 %79  }
  0x8d   :  { %75 = vst.msk [vmem:[#allocation0] ss:$8 sm:$0x3] %vm74_vm10, %v73_v27  }
  0x8e   :  { %82 = vst.msk [vmem:[#allocation0] ss:$8 sm:$0x3] %vm81_vm11, %v80_v28  }
  0x8f   :  { %89 = vst.msk [vmem:[#allocation0] ss:$8 sm:$0x3] %vm88_vm12, %v87_v22  }
  0x94   :  { %v94_v29 = vpop.permute.xlu0 %93   ;;  %v101_v30 = vpop.permute.xlu1 %100  }
  0x95   :  { %96 = vst.msk [vmem:[#allocation0] ss:$8 sm:$0x3] %vm95_vm13, %v94_v29  }
  0x96   :  { %103 = vst.msk [vmem:[#allocation0] ss:$8 sm:$0x3] %vm102_vm14, %v101_v30  }
  0x97   :  { %110 = vst.msk [vmem:[#allocation0] ss:$8 sm:$0x3] %vm109_vm15, %v108_v25  }
  0x9e   :  { %v113_v31 = vld [vmem:[#allocation0] sm:$0x1]  ;;  %v118_v32 = vld [vmem:[#allocation0 + $0x8] sm:$0x1] }
  0x9f   :  { %116 = vst [vmem:[%s234_s1] sm:$0x1] %v113_v31 }
  0xa0   :  { %138 = vst [vmem:[%s234_s1 + $0x1] sm:$0x1] %v118_v32 }

// kernel: upconv_forward.5
= control target key start
LH: loop header
LB: loop body
LE: loop exit
PB: predicated region body
PF: predicated region fallthrough
CT: control target
= control target key end

     0   :  { %s481_s12 = smov 0   ;;  %s605_s0 = inlined_call_operand.vmem [shape: bf16[16,128], index: 0, kind: input, shape index: {}]   ;;  %s606_s1 = inlined_call_operand.vmem [shape: bf16[128,256], index: 1, kind: input, shape index: {}]   ;;  %s607_s2 = inlined_call_operand.vmem [shape: f32[1,256], index: 2, kind: input, shape index: {}]   ;;  %s608_s3 = inlined_call_operand.vmem [shape: bf16[16,256], index: 3, kind: output, shape index: {}]  }
   0x1 LB: > { %s354_s13 = sadd.s32 4294967295, %s459_s12   ;;  %p358_p0 = scmp.ge.s32.totalorder %s459_s12, 1  ;;  %s459_s12 = sphi %s481_s12, %s13_s12  }
   0x2   : > { %p136_p1 = scmp.lt.s32.totalorder %s459_s12, 3 }
   0x4   : > { %p137_p2 = pnand %p358_p0, %p136_p1 }
   0x5   : > { %p159_p3 = scmp.lt.s32.totalorder (!%p137_p2), %s354_s13, 1 }
   0x6   : > { %140 = sbr.rel (%p137_p2) target bundleno = 180 (0xb4), region = 32 }
   0xb   : > { %v420_v0 = vld [vmem:[%s606_s1 + $0x70] sm:$0xf]  ;;  %v444_v1 = vld [vmem:[%s606_s1 + $0x74] sm:$0xf0]  ;;  %v443_v2 = vld [vmem:[%s606_s1 + $0x74] sm:$0xf] }
   0xc   : > { %v421_v3 = vor.u32 %v444_v1, %v420_v0  ;;  %v422_v4 = vld [vmem:[%s606_s1 + $0x78] sm:$0xf0]  ;;  %v412_v5 = vld [vmem:[%s606_s1 + $0x60] sm:$0xf]  ;;  %v442_v6 = vld [vmem:[%s606_s1 + $0x64] sm:$0xf0] }
   0xd   : > { %v425_v7 = vor.u32 %v443_v2, %v422_v4  ;;  %v441_v8 = vld [vmem:[%s606_s1 + $0x64] sm:$0xf]  ;;  %v414_v9 = vld [vmem:[%s606_s1 + $0x68] sm:$0xf0]  ;;  %v413_v10 = vor.u32 %v442_v6, %v412_v5  ;;  %v404_v12 = vld [vmem:[%s606_s1 + $0x50] sm:$0xf] }
   0xe   : > { %271 = vmatpush.bf16.msra.mxu0 %v421_v3  ;;  %v417_v11 = vor.u32 %v441_v8, %v414_v9  ;;  %v440_v13 = vld [vmem:[%s606_s1 + $0x54] sm:$0xf0]  ;;  %v439_v14 = vld [vmem:[%s606_s1 + $0x54] sm:$0xf]  ;;  %v406_v15 = vld [vmem:[%s606_s1 + $0x58] sm:$0xf0] }
   0xf   : > { %284 = vmatpush.bf16.msra.mxu1 %v425_v7  ;;  %v405_v16 = vor.u32 %v440_v13, %v404_v12  ;;  %v409_v17 = vor.u32 %v439_v14, %v406_v15  ;;  %v396_v18 = vld [vmem:[%s606_s1 + $0x40] sm:$0xf]  ;;  %v438_v19 = vld [vmem:[%s606_s1 + $0x44] sm:$0xf0]  ;;  %v437_v20 = vld [vmem:[%s606_s1 + $0x44] sm:$0xf] }
  0x10   : > { %v398_v21 = vld [vmem:[%s606_s1 + $0x48] sm:$0xf0]  ;;  %v397_v22 = vor.u32 %v438_v19, %v396_v18  ;;  %v388_v24 = vld [vmem:[%s606_s1 + $0x30] sm:$0xf]  ;;  %v436_v25 = vld [vmem:[%s606_s1 + $0x34] sm:$0xf0] }
  0x11   : > { %v401_v23 = vor.u32 %v437_v20, %v398_v21  ;;  %v435_v26 = vld [vmem:[%s606_s1 + $0x34] sm:$0xf]  ;;  %v390_v27 = vld [vmem:[%s606_s1 + $0x38] sm:$0xf0]  ;;  %v389_v28 = vor.u32 %v436_v25, %v388_v24  ;;  %v380_v30 = vld [vmem:[%s606_s1 + $0x20] sm:$0xf] }
  0x12   : > { %272 = vmatpush.bf16.msra.mxu0 %v413_v10  ;;  %v393_v29 = vor.u32 %v435_v26, %v390_v27  ;;  %v434_v31 = vld [vmem:[%s606_s1 + $0x24] sm:$0xf0]  ;;  %v433_v32 = vld [vmem:[%s606_s1 + $0x24] sm:$0xf]  ;;  %v382_v33 = vld [vmem:[%s606_s1 + $0x28] sm:$0xf0] }
  0x13   : > { %285 = vmatpush.bf16.msra.mxu1 %v417_v11  ;;  %v381_v34 = vor.u32 %v434_v31, %v380_v30  ;;  %v385_v35 = vor.u32 %v433_v32, %v382_v33  ;;  %v372_v36 = vld [vmem:[%s606_s1 + $0x10] sm:$0xf]  ;;  %v432_v37 = vld [vmem:[%s606_s1 + $0x14] sm:$0xf0]  ;;  %v431_v38 = vld [vmem:[%s606_s1 + $0x14] sm:$0xf] }
  0x14   : > { %v374_v39 = vld [vmem:[%s606_s1 + $0x18] sm:$0xf0]  ;;  %s610_s13 = smov (!%p159_p3, %s354_s13), 1  ;;  %v373_v40 = vor.u32 %v432_v37, %v372_v36  ;;  %v364_v42 = vld [vmem:[%s606_s1] sm:$0xf] }
  0x15   : > { %v377_v41 = vor.u32 %v431_v38, %v374_v39  ;;  %v430_v43 = vld [vmem:[%s606_s1 + $0x4] sm:$0xf0]  ;;  %v429_v44 = vld [vmem:[%s606_s1 + $0x4] sm:$0xf]  ;;  %v366_v45 = vld [vmem:[%s606_s1 + $0x8] sm:$0xf0] }
  0x16   : > { %273 = vmatpush.bf16.msra.mxu0 %v405_v16  ;;  %s359_s28 = sshll.u32 %s610_s13, 2  ;;  %v365_v46 = vor.u32 %v430_v43, %v364_v42  ;;  %v369_v47 = vor.u32 %v429_v44, %v366_v45  ;;  %v185_v49 = vld [vmem:[%s607_s2] sm:$0x3]  ;;  %s428_s7 = sshll.u32 %s610_s13, 3 }
  0x17   : > { %286 = vmatpush.bf16.msra.mxu1 %v409_v17  ;;  %s162_s4 = scalar_lea.vmem %s605_s0, %s359_s28  ;;  %v187_v50 = vperm.slane %v185_v49, 0  ;;  %v188_v51 = vperm.slane %v185_v49, 1  ;;  %s167_s10 = scalar_lea.vmem %s608_s3, %s428_s7 }
  0x18   : > { %v168_v48 = vld [vmem:[%s162_s4] sm:$0xf] }
  0x1a   : > { %274 = vmatpush.bf16.msra.mxu0 %v397_v22 }
  0x1b   : > { %287 = vmatpush.bf16.msra.mxu1 %v401_v23 }
  0x1e   : > { %275 = vmatpush.bf16.msra.mxu0 %v389_v28 }
  0x1f   : > { %288 = vmatpush.bf16.msra.mxu1 %v393_v29 }
  0x22   : > { %276 = vmatpush.bf16.msra.mxu0 %v381_v34 }
  0x23   : > { %289 = vmatpush.bf16.msra.mxu1 %v385_v35 }
  0x26   : > { %277 = vmatpush.bf16.msra.mxu0 %v373_v40 }
  0x27   : > { %290 = vmatpush.bf16.msra.mxu1 %v377_v41 }
  0x2a   : > { %278 = vmatpush.bf16.msra.mxu0 %v365_v46 }
  0x2b   : > { %291 = vmatpush.bf16.msra.mxu1 %v369_v47 }
  0x2d   : > { %279 = vmatmul.bf16.vlgmr.msra.gmra.mxu0 %v168_v48 }
  0x2e   : > { %292 = vmatmul.bf16.vlgmr.msra.gmra.mxu1 %v168_v48 }
  0xaa   : > { %v280_v52 = vpop.f32.mrf.mxu0 }
  0xab   : > { %v281_v53 = vadd.f32 %v280_v52, %v187_v50  ;;  %v293_v54 = vpop.f32.mrf.mxu1 }
  0xac   : > { %v294_v55 = vadd.f32 %v293_v54, %v188_v51 }
  0xae   : > { %v297_v56 = vpack.c.bf16 %v294_v55, %v281_v53 }
  0xb0   : > { %298 = vst [vmem:[%s167_s10] sm:$0xff] %v297_v56 }
  0xb2   : > { %v282_v57 = vpop.f32.mrf.mxu0 }
  0xb3   : > { %v295_v58 = vpop.f32.mrf.mxu1 }
  0xb4 PF: > { %s13_s12 = sadd.s32 1, %s459_s12  }
  0xb5   : > { %p10_p4 = scmp.ge.s32.totalorder %s13_s12, 4  }
  0xb7   :  { %12 = sbr.rel (!%p10_p4) target bundleno = 1 (0x1), region = 62 }

// kernel: upconv_forward.6
= control target key start
LH: loop header
LB: loop body
LE: loop exit
PB: predicated region body
PF: predicated region fallthrough
CT: control target
= control target key end

     0   :  { %s1343_s21 = smov 0   ;;  %s1529_s0 = inlined_call_operand.vmem [shape: bf16[32,128], index: 0, kind: input, shape index: {}]   ;;  %s1530_s1 = inlined_call_operand.vmem [shape: bf16[32,128], index: 1, kind: input, shape index: {}]   ;;  %s1531_s2 = inlined_call_operand.vmem [shape: bf16[3,128,128], index: 2, kind: input, shape index: {}]   ;;  %s1532_s3 = inlined_call_operand.vmem [shape: bf16[3,128,128], index: 3, kind: input, shape index: {}]   ;;  %s1533_s4 = inlined_call_operand.vmem [shape: f32[1,128], index: 4, kind: input, shape index: {}]   ;;  %s1534_s5 = inlined_call_operand.vmem [shape: bf16[32,128], index: 5, kind: output, shape index: {0}]   ;;  %s1535_s6 = inlined_call_operand.vmem [shape: f32[2,8,128], index: 6, kind: output, shape index: {1}]  }
   0x1 LB: > { %s1349_s22 = sadd.s32 4294967295, %s1306_s21   ;;  %p962_p0 = scmp.ge.s32.totalorder %s1306_s21, 1  ;;  %s1306_s21 = sphi %s1343_s21, %s17_s21  }
   0x2   : > { %p227_p1 = scmp.lt.s32.totalorder %s1306_s21, 3 }
   0x4   : > { %p228_p2 = pnand %p962_p0, %p227_p1 }
   0x5   : > { %s963_s13 = sshll.u32 (!%p228_p2), %s1349_s22, 1  ;;  %p284_p4 = scmp.lt.s32.totalorder (!%p228_p2), %s1349_s22, 1 }
   0x6   : > { %231 = sbr.rel (%p228_p2) target bundleno = 257 (0x101), region = 40  ;;  %p267_p3 = scmp.lt.s32.totalorder (!%p228_p2), %s963_s13, 3 }
   0xb   : > { %v1269_v0 = vld [vmem:[%s1532_s3 + $0x38] sm:$0xff]  ;;  %v1268_v4 = vld [vmem:[%s1532_s3 + $0x30] sm:$0xff]  ;;  %v1267_v8 = vld [vmem:[%s1532_s3 + $0x28] sm:$0xff]  ;;  %s1539_s13 = smov (!%p267_p3, %s963_s13), 3  ;;  %v776_v54 = vlaneseq  ;;  %s1541_s22 = smov (!%p284_p4, %s1349_s22), 1  ;;  %vm854_vm4 = vcmask 1040384  }
   0xc   : > { %v1244_v1 = vld [vmem:[%s1531_s2 + $0x38] sm:$0xff]  ;;  %412 = vmatpush.bf16.msra.mxu0 %v1269_v0  ;;  %v1243_v5 = vld [vmem:[%s1531_s2 + $0x30] sm:$0xff]  ;;  %v1242_v9 = vld [vmem:[%s1531_s2 + $0x28] sm:$0xff]  ;;  %s1438_s12 = sshll.u32 %s1539_s13, 2  ;;  %vm856_vm5 = vcmask 1041408  }
   0xd   : > { %v1277_v2 = vld [vmem:[%s1532_s3 + $0x78] sm:$0xff]  ;;  %480 = vmatpush.bf16.msra.mxu1 %v1244_v1  ;;  %v1276_v6 = vld [vmem:[%s1532_s3 + $0x70] sm:$0xff]  ;;  %v1275_v10 = vld [vmem:[%s1532_s3 + $0x68] sm:$0xff]  ;;  %s276_s29 = scalar_lea.vmem %s1530_s1, %s1438_s12  ;;  %s270_s8 = scalar_lea.vmem %s1529_s0, %s1438_s12  ;;  %v777_v59 = vshrl.u32 %v776_v54, 7 }
   0xe   : > { %v1252_v3 = vld [vmem:[%s1531_s2 + $0x78] sm:$0xff]  ;;  %559 = vmatpush.bf16.msra.mxu2 %v1277_v2  ;;  %v1251_v7 = vld [vmem:[%s1531_s2 + $0x70] sm:$0xff]  ;;  %v1250_v11 = vld [vmem:[%s1531_s2 + $0x68] sm:$0xff]  ;;  %s282_s23 = scalar_lea.vmem %s1534_s5, %s1438_s12  ;;  %s969_s12 = sshll.u32 %s1541_s22, 3 }
   0xf   : > { %621 = vmatpush.bf16.msra.mxu3 %v1252_v3  ;;  %v1266_v12 = vld [vmem:[%s1532_s3 + $0x20] sm:$0xff]  ;;  %v1265_v16 = vld [vmem:[%s1532_s3 + $0x18] sm:$0xff]  ;;  %v1264_v20 = vld [vmem:[%s1532_s3 + $0x10] sm:$0xff]  ;;  %v783_v63 = vand.u32 15, %v777_v59  ;;  %vm807_vm0 = vcmp.lt.s32.totalorder %v777_v59, 1  ;;  %v778_v1 = vadd.s32 8, %v777_v59  ;;  %s287_s26 = scalar_lea.vmem %s1535_s6, %s969_s12 }
  0x10   : > { %413 = vmatpush.bf16.msra.mxu0 %v1268_v4  ;;  %v1241_v13 = vld [vmem:[%s1531_s2 + $0x20] sm:$0xff]  ;;  %v1240_v17 = vld [vmem:[%s1531_s2 + $0x18] sm:$0xff]  ;;  %v1239_v21 = vld [vmem:[%s1531_s2 + $0x10] sm:$0xff]  ;;  %vm816_vm2 = vcmp.lt.s32.totalorder %v777_v59, 7 }
  0x11   : > { %481 = vmatpush.bf16.msra.mxu1 %v1243_v5  ;;  %v1274_v14 = vld [vmem:[%s1532_s3 + $0x60] sm:$0xff]  ;;  %v1273_v18 = vld [vmem:[%s1532_s3 + $0x58] sm:$0xff]  ;;  %v1272_v22 = vld [vmem:[%s1532_s3 + $0x50] sm:$0xff]  ;;  %vm1508_vm1 = vcmp.eq.s32.totalorder %v783_v63, 0 }
  0x12   : > { %560 = vmatpush.bf16.msra.mxu2 %v1276_v6  ;;  %v1249_v15 = vld [vmem:[%s1531_s2 + $0x60] sm:$0xff]  ;;  %v1248_v19 = vld [vmem:[%s1531_s2 + $0x58] sm:$0xff]  ;;  %v1247_v23 = vld [vmem:[%s1531_s2 + $0x50] sm:$0xff] }
  0x13   : > { %622 = vmatpush.bf16.msra.mxu3 %v1251_v7  ;;  %v1263_v24 = vld [vmem:[%s1532_s3 + $0x8] sm:$0xff]  ;;  %v1262_v28 = vld [vmem:[%s1532_s3] sm:$0xff]  ;;  %v1285_v30 = vld [vmem:[%s1532_s3 + $0xb8] sm:$0xff]  ;;  %v790_v7 = vand.u32 15, %v778_v1 }
  0x14   : > { %414 = vmatpush.bf16.msra.mxu0 %v1267_v8  ;;  %v1238_v25 = vld [vmem:[%s1531_s2 + $0x8] sm:$0xff]  ;;  %v1237_v29 = vld [vmem:[%s1531_s2] sm:$0xff]  ;;  %v1260_v31 = vld [vmem:[%s1531_s2 + $0xb8] sm:$0xff] }
  0x15   : > { %482 = vmatpush.bf16.msra.mxu1 %v1242_v9  ;;  %v1271_v26 = vld [vmem:[%s1532_s3 + $0x48] sm:$0xff]  ;;  %v1270_v32 = vld [vmem:[%s1532_s3 + $0x40] sm:$0xff]  ;;  %v1284_v36 = vld [vmem:[%s1532_s3 + $0xb0] sm:$0xff]  ;;  %vm813_vm3 = vcmp.eq.s32.totalorder %v790_v7, 15 }
  0x16   : > { %561 = vmatpush.bf16.msra.mxu2 %v1275_v10  ;;  %v1246_v27 = vld [vmem:[%s1531_s2 + $0x48] sm:$0xff]  ;;  %v1245_v33 = vld [vmem:[%s1531_s2 + $0x40] sm:$0xff]  ;;  %v1259_v37 = vld [vmem:[%s1531_s2 + $0xb0] sm:$0xff] }
  0x17   : > { %623 = vmatpush.bf16.msra.mxu3 %v1250_v11  ;;  %v1261_v34 = vld [vmem:[%s276_s29] sm:$0xff]  ;;  %v1283_v38 = vld [vmem:[%s1532_s3 + $0xa8] sm:$0xff]  ;;  %v1281_v42 = vld [vmem:[%s1532_s3 + $0x98] sm:$0xff] }
  0x18   : > { %415 = vmatpush.bf16.msra.mxu0 %v1266_v12  ;;  %v1236_v35 = vld [vmem:[%s270_s8] sm:$0xff]  ;;  %v1258_v39 = vld [vmem:[%s1531_s2 + $0xa8] sm:$0xff]  ;;  %v1256_v43 = vld [vmem:[%s1531_s2 + $0x98] sm:$0xff] }
  0x19   : > { %483 = vmatpush.bf16.msra.mxu1 %v1241_v13  ;;  %v1282_v40 = vld [vmem:[%s1532_s3 + $0xa0] sm:$0xff]  ;;  %v1280_v44 = vld [vmem:[%s1532_s3 + $0x90] sm:$0xff]  ;;  %v1279_v46 = vld [vmem:[%s1532_s3 + $0x88] sm:$0xff] }
  0x1a   : > { %562 = vmatpush.bf16.msra.mxu2 %v1274_v14  ;;  %v1257_v41 = vld [vmem:[%s1531_s2 + $0xa0] sm:$0xff]  ;;  %v1255_v45 = vld [vmem:[%s1531_s2 + $0x90] sm:$0xff]  ;;  %v1254_v47 = vld [vmem:[%s1531_s2 + $0x88] sm:$0xff] }
  0x1b   : > { %624 = vmatpush.bf16.msra.mxu3 %v1249_v15  ;;  %v1278_v48 = vld [vmem:[%s1532_s3 + $0x80] sm:$0xff] }
  0x1c   : > { %416 = vmatpush.bf16.msra.mxu0 %v1265_v16  ;;  %v1253_v49 = vld [vmem:[%s1531_s2 + $0x80] sm:$0xff] }
  0x1d   : > { %484 = vmatpush.bf16.msra.mxu1 %v1240_v17 }
  0x1e   : > { %563 = vmatpush.bf16.msra.mxu2 %v1273_v18  ;;  %v1299_v18 = vld [vmem:[%s1533_s4] ss:$0 sm:$0xff] }
  0x1f   : > { %625 = vmatpush.bf16.msra.mxu3 %v1248_v19 }
  0x20   : > { %417 = vmatpush.bf16.msra.mxu0 %v1264_v20 }
  0x21   : > { %485 = vmatpush.bf16.msra.mxu1 %v1239_v21 }
  0x22   : > { %564 = vmatpush.bf16.msra.mxu2 %v1272_v22 }
  0x23   : > { %626 = vmatpush.bf16.msra.mxu3 %v1247_v23 }
  0x24   : > { %418 = vmatpush.bf16.msra.mxu0 %v1263_v24 }
  0x25   : > { %486 = vmatpush.bf16.msra.mxu1 %v1238_v25 }
  0x26   : > { %565 = vmatpush.bf16.msra.mxu2 %v1271_v26 }
  0x27   : > { %627 = vmatpush.bf16.msra.mxu3 %v1246_v27 }
  0x28   : > { %419 = vmatpush.bf16.msra.mxu0 %v1262_v28 }
  0x29   : > { %487 = vmatpush.bf16.msra.mxu1 %v1237_v29 }
  0x2a   : > { %566 = vmatpush.bf16.msra.mxu2 %v1270_v32 }
  0x2b   : > { %628 = vmatpush.bf16.msra.mxu3 %v1245_v33  ;;  %420 = vmatmul.bf16.vlgmr.msra.gmra.mxu0 %v1261_v34 }
  0x2c   : > { %700 = vmatpush.bf16.msrb.mxu0 %v1285_v30  ;;  %488 = vmatmul.bf16.vlgmr.msra.gmra.mxu1 %v1236_v35 }
  0x2d   : > { %762 = vmatpush.bf16.msrb.mxu1 %v1260_v31  ;;  %567 = vmatmul.bf16.vlgmr.msra.gmra.mxu2 %v1261_v34 }
  0x2e   : > { %629 = vmatmul.bf16.vlgmr.msra.gmra.mxu3 %v1236_v35 }
  0x30   : > { %701 = vmatpush.bf16.msrb.mxu0 %v1284_v36 }
  0x31   : > { %763 = vmatpush.bf16.msrb.mxu1 %v1259_v37 }
  0x34   : > { %702 = vmatpush.bf16.msrb.mxu0 %v1283_v38 }
  0x35   : > { %764 = vmatpush.bf16.msrb.mxu1 %v1258_v39 }
  0x38   : > { %703 = vmatpush.bf16.msrb.mxu0 %v1282_v40 }
  0x39   : > { %765 = vmatpush.bf16.msrb.mxu1 %v1257_v41 }
  0x3c   : > { %704 = vmatpush.bf16.msrb.mxu0 %v1281_v42 }
  0x3d   : > { %766 = vmatpush.bf16.msrb.mxu1 %v1256_v43 }
  0x40   : > { %705 = vmatpush.bf16.msrb.mxu0 %v1280_v44 }
  0x41   : > { %767 = vmatpush.bf16.msrb.mxu1 %v1255_v45 }
  0x44   : > { %706 = vmatpush.bf16.msrb.mxu0 %v1279_v46 }
  0x45   : > { %768 = vmatpush.bf16.msrb.mxu1 %v1254_v47 }
  0x48   : > { %707 = vmatpush.bf16.msrb.mxu0 %v1278_v48 }
  0x49   : > { %769 = vmatpush.bf16.msrb.mxu1 %v1253_v49 }
  0x4b   : > { %708 = vmatmul.bf16.vlgmr.msrb.gmra.mxu0 %v1261_v34 }
  0x4c   : > { %770 = vmatmul.bf16.vlgmr.msrb.gmra.mxu1 %v1236_v35 }
  0xa8   : > { %v421_v50 = vpop.f32.mrf.mxu0 }
  0xa9   : > { %v489_v51 = vpop.f32.mrf.mxu1 }
  0xaa   : > { %v490_v57 = vadd.f32 %v489_v51, %v421_v50 }
  0xac   : > { %v805_v62 = vrot.slane %v490_v57, 7 }
  0xb0   : > { %v423_v52 = vpop.f32.mrf.mxu0  ;;  %v568_v55 = vpop.f32.mrf.mxu2 }
  0xb1   : > { %v491_v53 = vpop.f32.mrf.mxu1  ;;  %v630_v56 = vpop.f32.mrf.mxu3 }
  0xb2   : > { %v492_v58 = vadd.f32 %v491_v53, %v423_v52  ;;  %v631_v8 = vadd.f32 %v630_v56, %v568_v55 }
  0xb4   : > { %v806_v0 = vrot.slane %v492_v58, 7 }
  0xb6   : > { %v809_v3 = vsel %vm807_vm0, %v806_v0, %v805_v62  ;;  %v808_v14 = vsel %vm807_vm0, %v805_v62, %v806_v0 }
  0xb7   : > { %v810_v11 = vsel %vm1508_vm1, 0.0, %v809_v3 }
  0xb8   : > { %v570_v4 = vpop.f32.mrf.mxu2  ;;  %v821_v17 = vadd.f32 %v810_v11, %v631_v8 }
  0xb9   : > { %v632_v5 = vpop.f32.mrf.mxu3 }
  0xba   : > { %v633_v12 = vadd.f32 %v632_v5, %v570_v4 }
  0xbc   : > { %v822_v19 = vadd.f32 %v808_v14, %v633_v12 }
  0xc8   : > { %v709_v60 = vpop.f32.mrf.mxu0 }
  0xc9   : > { %v771_v61 = vpop.f32.mrf.mxu1 }
  0xca   : > { %v772_v6 = vadd.f32 %v771_v61, %v709_v60 }
  0xcc   : > { %v814_v15 = vrot.slane %v772_v6, 1 }
  0xd0   : > { %v711_v9 = vpop.f32.mrf.mxu0 }
  0xd1   : > { %v773_v10 = vpop.f32.mrf.mxu1 }
  0xd2   : > { %v774_v13 = vadd.f32 %v773_v10, %v711_v9 }
  0xd4   : > { %v815_v16 = vrot.slane %v774_v13, 1 }
  0xd6   : > { %v817_v20 = vsel %vm816_vm2, %v814_v15, %v815_v16  ;;  %v818_v21 = vsel %vm816_vm2, %v815_v16, %v814_v15 }
  0xd7   : > { %v820_v22 = vsel %vm813_vm3, 0.0, %v818_v21  ;;  %v823_v23 = vadd.f32 %v821_v17, %v817_v20 }
  0xd8   : > { %v824_v24 = vadd.f32 %v822_v19, %v820_v22 }
  0xd9   : > { %v829_v25 = vadd.f32 %v1299_v18, %v823_v23 }
  0xda   : > { %v830_v26 = vadd.f32 %v1299_v18, %v824_v24 }
  0xdc   : > { %v1289_v27 = vpack.c.bf16 %v830_v26, %v829_v25  ;;  %v835_v28 = vadd.f32 %v830_v26, %v829_v25 }
  0xde   : > { %1290 = vst [vmem:[%s282_s23] sm:$0xff] %v1289_v27   ;;  %v836_v29 = vrot.slane %v835_v28, 4 }
  0xe0   : > { %v837_v30 = vadd.f32 %v836_v29, %v835_v28 }
  0xe2   : > { %v838_v31 = vrot.slane %v837_v30, 2 }
  0xe4   : > { %v839_v32 = vadd.f32 %v838_v31, %v837_v30 }
  0xe6   : > { %v840_v33 = vrot.slane %v839_v32, 1 }
  0xe8   : > { %v841_v34 = vadd.f32 %v840_v33, %v839_v32 }
  0xea   : > { %v842_v35 = vmul.f32 0.0625, %v841_v34 }
  0xec   : > { %v843_v36 = vsub.f32 %v829_v25, %v842_v35  ;;  %v844_v37 = vsub.f32 %v830_v26, %v842_v35 }
  0xee   : > { %v845_v38 = vmul.f32 %v843_v36, %v843_v36  ;;  %v846_v39 = vmul.f32 %v844_v37, %v844_v37 }
  0xf0   : > { %v847_v40 = vadd.f32 %v846_v39, %v845_v38 }
  0xf2   : > { %v848_v41 = vrot.slane %v847_v40, 4 }
  0xf4   : > { %v849_v42 = vadd.f32 %v848_v41, %v847_v40 }
  0xf6   : > { %v850_v43 = vrot.slane %v849_v42, 2 }
  0xf8   : > { %v851_v44 = vadd.f32 %v850_v43, %v849_v42 }
  0xfa   : > { %v852_v45 = vrot.slane %v851_v44, 1 }
  0xfc   : > { %v853_v46 = vadd.f32 %v852_v45, %v851_v44 }
  0xfe   : > { %v855_v47 = vsel %vm854_vm4, %v841_v34, %v853_v46 }
  0xff   : > { %v857_v48 = vsel %vm856_vm5, %v855_v47, 0.0 }
 0x100   : > { %858 = vst [vmem:[%s287_s26] sm:$0xff] %v857_v48 }
 0x101 PF: > { %s17_s21 = sadd.s32 1, %s1306_s21  }
 0x102   : > { %p14_p5 = scmp.ge.s32.totalorder %s17_s21, 4  }
 0x104   :  { %16 = sbr.rel (!%p14_p5) target bundleno = 1 (0x1), region = 89 }

// kernel: squeeze.53
= control target key start
LH: loop header
LB: loop body
LE: loop exit
PB: predicated region body
PF: predicated region fallthrough
CT: control target
= control target key end

     0   :  { %s130_s8 = smov 120   ;;  %s131_s9 = smov 88   ;;  %vm7_vm0 = vcmask 64512   ;;  %s221_s0 = inlined_call_operand.vmem [shape: f32[2,128], index: 0, kind: input, shape index: {}]   ;;  %s222_s1 = inlined_call_operand.vmem [shape: f32[32,8], index: 1, kind: output, shape index: {}]  }
   0x1   :  { %v4_v0 = vld [vmem:[%s221_s0] sm:$0x3]  ;;  %s129_s0 = smov 104   ;;  %s132_s10 = smov 96  }
   0x2   :  { %5 = vst [vmem:[#allocation0] sm:$0x3] %v4_v0  ;;  %s133_s11 = smov 112   ;;  %s134_s12 = smov 80  }
   0x3   :  { %s135_s13 = smov 64   ;;  %s136_s14 = smov 72  }
   0x4   :  { %s137_s15 = smov 56   ;;  %s138_s16 = smov 40  }
   0x5   :  { %s139_s17 = smov 48   ;;  %s140_s18 = smov 32  }
   0x6   :  { %s141_s19 = smov 16   ;;  %s142_s20 = smov 24  }
   0x7   :  { %s143_s21 = smov 8  }
   0x9   :  { %v21_v1 = vld [vmem:[#allocation0] sm:$0x3]  }
   0xa   :  { %v9_v2 = vld [vmem:[#allocation0] sm:$0x3]   ;;  %22 = vrot.lane.b32.xlu1 %v21_v1, %s129_s0 }
   0xb   :  { %10 = vrot.lane.b32.xlu0 %v9_v2, %s130_s8  ;;  %v33_v3 = vld [vmem:[#allocation0] sm:$0x3]  }
   0xc   :  { %34 = vrot.lane.b32.xlu2 %v33_v3, %s131_s9  ;;  %v27_v4 = vld [vmem:[#allocation0] sm:$0x3]  }
   0xd   :  { %v15_v5 = vld [vmem:[#allocation0] sm:$0x3]  }
   0xe   :  { %v39_v6 = vld [vmem:[#allocation0] sm:$0x3]  }
   0xf   :  { %v51_v7 = vld [vmem:[#allocation0] sm:$0x3]  }
  0x10   :  { %v45_v8 = vld [vmem:[#allocation0] sm:$0x3]  }
  0x11   :  { %v57_v9 = vld [vmem:[#allocation0] sm:$0x3]  }
  0x12   :  { %28 = vrot.lane.b32.xlu1 %v27_v4, %s132_s10  ;;  %v69_v10 = vld [vmem:[#allocation0] sm:$0x3]  }
  0x13   :  { %16 = vrot.lane.b32.xlu0 %v15_v5, %s133_s11  ;;  %v63_v11 = vld [vmem:[#allocation0] sm:$0x3]  }
  0x14   :  { %40 = vrot.lane.b32.xlu2 %v39_v6, %s134_s12  ;;  %v75_v12 = vld [vmem:[#allocation0] sm:$0x3]  }
  0x15   :  { %v87_v13 = vld [vmem:[#allocation0] sm:$0x3]  }
  0x16   :  { %v81_v14 = vld [vmem:[#allocation0] sm:$0x3]  }
  0x17   :  { %v93_v15 = vld [vmem:[#allocation0] sm:$0x3]  }
  0x18   :  { %v6_v21 = vld [vmem:[#allocation0] sm:$0x3]  }
  0x19   :  { %8 = vst.msk [vmem:[%s222_s1] ss:$16 sm:$0x3] %vm7_vm0, %v6_v21  }
  0x1a   :  { %52 = vrot.lane.b32.xlu1 %v51_v7, %s135_s13 }
  0x1b   :  { %46 = vrot.lane.b32.xlu0 %v45_v8, %s136_s14 }
  0x1c   :  { %58 = vrot.lane.b32.xlu2 %v57_v9, %s137_s15 }
  0x22   :  { %70 = vrot.lane.b32.xlu1 %v69_v10, %s138_s16 }
  0x23   :  { %64 = vrot.lane.b32.xlu0 %v63_v11, %s139_s17 }
  0x24   :  { %76 = vrot.lane.b32.xlu2 %v75_v12, %s140_s18 }
  0x2a   :  { %88 = vrot.lane.b32.xlu1 %v87_v13, %s141_s19 }
  0x2b   :  { %82 = vrot.lane.b32.xlu0 %v81_v14, %s142_s20 }
  0x2c   :  { %94 = vrot.lane.b32.xlu2 %v93_v15, %s143_s21 }
  0x66   :  { %v35_v16 = vpop.permute.xlu2 %34  }
  0x67   :  { %103 = vst.msk [vmem:[%s222_s1 + $0x5] ss:$16 sm:$0x3] %vm7_vm0, %v35_v16  }
  0x6e   :  { %v41_v17 = vpop.permute.xlu2 %40  }
  0x6f   :  { %104 = vst.msk [vmem:[%s222_s1 + $0x6] ss:$16 sm:$0x3] %vm7_vm0, %v41_v17  }
  0x76   :  { %v59_v18 = vpop.permute.xlu2 %58  }
  0x77   :  { %107 = vst.msk [vmem:[%s222_s1 + $0x9] ss:$16 sm:$0x3] %vm7_vm0, %v59_v18  }
  0x7c   :  { %v23_v19 = vpop.permute.xlu1 %22  }
  0x7d   :  { %v11_v20 = vpop.permute.xlu0 %10   ;;  %101 = vst.msk [vmem:[%s222_s1 + $0x3] ss:$16 sm:$0x3] %vm7_vm0, %v23_v19  }
  0x7e   :  { %99 = vst.msk [vmem:[%s222_s1 + $0x1] ss:$16 sm:$0x3] %vm7_vm0, %v11_v20   ;;  %v77_v22 = vpop.permute.xlu2 %76  }
  0x7f   :  { %110 = vst.msk [vmem:[%s222_s1 + $0xc] ss:$16 sm:$0x3] %vm7_vm0, %v77_v22  }
  0x84   :  { %v29_v23 = vpop.permute.xlu1 %28  }
  0x85   :  { %v17_v24 = vpop.permute.xlu0 %16   ;;  %102 = vst.msk [vmem:[%s222_s1 + $0x4] ss:$16 sm:$0x3] %vm7_vm0, %v29_v23  }
  0x86   :  { %100 = vst.msk [vmem:[%s222_s1 + $0x2] ss:$16 sm:$0x3] %vm7_vm0, %v17_v24   ;;  %v95_v25 = vpop.permute.xlu2 %94  }
  0x87   :  { %113 = vst.msk [vmem:[%s222_s1 + $0xf] ss:$16 sm:$0x3] %vm7_vm0, %v95_v25  }
  0x8c   :  { %v53_v26 = vpop.permute.xlu1 %52  }
  0x8d   :  { %v47_v27 = vpop.permute.xlu0 %46   ;;  %106 = vst.msk [vmem:[%s222_s1 + $0x8] ss:$16 sm:$0x3] %vm7_vm0, %v53_v26  }
  0x8e   :  { %105 = vst.msk [vmem:[%s222_s1 + $0x7] ss:$16 sm:$0x3] %vm7_vm0, %v47_v27  }
  0x94   :  { %v71_v28 = vpop.permute.xlu1 %70  }
  0x95   :  { %v65_v29 = vpop.permute.xlu0 %64   ;;  %109 = vst.msk [vmem:[%s222_s1 + $0xb] ss:$16 sm:$0x3] %vm7_vm0, %v71_v28  }
  0x96   :  { %108 = vst.msk [vmem:[%s222_s1 + $0xa] ss:$16 sm:$0x3] %vm7_vm0, %v65_v29  }
  0x9c   :  { %v89_v30 = vpop.permute.xlu1 %88  }
  0x9d   :  { %v83_v31 = vpop.permute.xlu0 %82   ;;  %112 = vst.msk [vmem:[%s222_s1 + $0xe] ss:$16 sm:$0x3] %vm7_vm0, %v89_v30  }
  0x9e   :  { %111 = vst.msk [vmem:[%s222_s1 + $0xd] ss:$16 sm:$0x3] %vm7_vm0, %v83_v31  }

// kernel: upconv_forward.7
= control target key start
LH: loop header
LB: loop body
LE: loop exit
PB: predicated region body
PF: predicated region fallthrough
CT: control target
= control target key end

     0   :  { %s314_s12 = smov 0   ;;  %s337_s0 = inlined_call_operand.vmem [shape: bf16[32,128], index: 0, kind: input, shape index: {}]   ;;  %s338_s1 = inlined_call_operand.vmem [shape: f32[1,128], index: 1, kind: input, shape index: {}]   ;;  %s339_s2 = inlined_call_operand.vmem [shape: f32[1,128], index: 2, kind: input, shape index: {}]   ;;  %s340_s3 = inlined_call_operand.vmem [shape: bf16[32,128], index: 3, kind: output, shape index: {}]  }
   0x1 LB: > { %s256_s13 = sadd.s32 4294967295, %s292_s12   ;;  %p260_p0 = scmp.ge.s32.totalorder %s292_s12, 1  ;;  %s292_s12 = sphi %s314_s12, %s13_s12  }
   0x2   : > { %p138_p1 = scmp.lt.s32.totalorder %s292_s12, 3 }
   0x4   : > { %p139_p2 = pnand %p260_p0, %p138_p1 }
   0x5   : > { %s261_s14 = sshll.u32 (!%p139_p2), %s256_s13, 1 }
   0x6   : > { %142 = sbr.rel (%p139_p2) target bundleno = 27 (0x1b), region = 32  ;;  %p163_p3 = scmp.lt.s32.totalorder (!%p139_p2), %s261_s14, 3 }
   0xb   : > { %s342_s14 = smov (!%p163_p3, %s261_s14), 3  ;;  %v284_v0 = vld [vmem:[%s338_s1] ss:$0 sm:$0xff] }
   0xc   : > { %s262_s15 = sshll.u32 %s342_s14, 2  ;;  %v285_v4 = vld [vmem:[%s339_s2] ss:$0 sm:$0xff] }
   0xd   : > { %s166_s18 = scalar_lea.vmem %s337_s0, %s262_s15  ;;  %s172_s25 = scalar_lea.vmem %s340_s3, %s262_s15 }
   0xe   : > { %v268_v1 = vld [vmem:[%s166_s18] sm:$0xff]  }
   0xf   : > { %v269_v2 = vunpack.c.l.bf16 %v268_v1  ;;  %v270_v3 = vunpack.c.h.bf16 %v268_v1 }
  0x11   : > { %v182_v5 = vmul.f32 %v284_v0, %v269_v2  ;;  %v183_v6 = vmul.f32 %v284_v0, %v270_v3 }
  0x13   : > { %v188_v7 = vadd.f32 %v285_v4, %v182_v5  ;;  %v189_v8 = vadd.f32 %v285_v4, %v183_v6 }
  0x15   : > { %vm190_vm0 = vcmp.gt.f32.partialorder %v188_v7, 0.0  ;;  %vm191_vm1 = vcmp.gt.f32.partialorder %v189_v8, 0.0  ;;  %v192_v9 = vmul.f32 0.1, %v188_v7  ;;  %v193_v10 = vmul.f32 0.1, %v189_v8 }
  0x17   : > { %v194_v11 = vsel %vm190_vm0, %v188_v7, %v192_v9  ;;  %v195_v12 = vsel %vm191_vm1, %v189_v8, %v193_v10 }
  0x18   : > { %v274_v13 = vpack.c.bf16 %v195_v12, %v194_v11 }
  0x1a   : > { %275 = vst [vmem:[%s172_s25] sm:$0xff] %v274_v13  }
  0x1b PF: > { %s13_s12 = sadd.s32 1, %s292_s12  }
  0x1c   : > { %p10_p4 = scmp.ge.s32.totalorder %s13_s12, 4  }
  0x1e   :  { %12 = sbr.rel (!%p10_p4) target bundleno = 1 (0x1), region = 62 }

// kernel: upconv_forward.8
= control target key start
LH: loop header
LB: loop body
LE: loop exit
PB: predicated region body
PF: predicated region fallthrough
CT: control target
= control target key end

     0   :  { %s840_s15 = smov 0   ;;  %s947_s0 = inlined_call_operand.vmem [shape: bf16[32,128], index: 0, kind: input, shape index: {}]   ;;  %s948_s1 = inlined_call_operand.vmem [shape: bf16[3,128,128], index: 1, kind: input, shape index: {}]   ;;  %s949_s2 = inlined_call_operand.vmem [shape: f32[1,128], index: 2, kind: input, shape index: {}]   ;;  %s950_s3 = inlined_call_operand.vmem [shape: bf16[32,128], index: 3, kind: output, shape index: {0}]   ;;  %s951_s4 = inlined_call_operand.vmem [shape: f32[2,8,128], index: 4, kind: output, shape index: {1}]  }
   0x1 LB: > { %s846_s16 = sadd.s32 4294967295, %s813_s15   ;;  %p628_p0 = scmp.ge.s32.totalorder %s813_s15, 1  ;;  %s813_s15 = sphi %s840_s15, %s15_s15  }
   0x2   : > { %p166_p1 = scmp.lt.s32.totalorder %s813_s15, 3 }
   0x4   : > { %p167_p2 = pnand %p628_p0, %p166_p1 }
   0x5   : > { %s629_s17 = sshll.u32 (!%p167_p2), %s846_s16, 1  ;;  %p208_p4 = scmp.lt.s32.totalorder (!%p167_p2), %s846_s16, 1 }
   0x6   : > { %170 = sbr.rel (%p167_p2) target bundleno = 228 (0xe4), region = 32  ;;  %p197_p3 = scmp.lt.s32.totalorder (!%p167_p2), %s629_s17, 3 }
   0xb   : > { %v776_v0 = vld [vmem:[%s948_s1 + $0x38] sm:$0xff]  ;;  %v775_v3 = vld [vmem:[%s948_s1 + $0x30] sm:$0xff]  ;;  %v774_v6 = vld [vmem:[%s948_s1 + $0x28] sm:$0xff]  ;;  %s953_s17 = smov (!%p197_p3, %s629_s17), 3  ;;  %v394_v25 = vlaneseq  ;;  %s955_s16 = smov (!%p208_p4, %s846_s16), 1  ;;  %vm532_vm4 = vcmask 1040384  }
   0xc   : > { %v792_v1 = vld [vmem:[%s948_s1 + $0xb8] sm:$0xff]  ;;  %284 = vmatpush.bf16.msra.mxu0 %v776_v0  ;;  %v791_v4 = vld [vmem:[%s948_s1 + $0xb0] sm:$0xff]  ;;  %v790_v7 = vld [vmem:[%s948_s1 + $0xa8] sm:$0xff]  ;;  %s630_s10 = sshll.u32 %s953_s17, 2  ;;  %s633_s17 = sshll.u32 %s955_s16, 3  ;;  %vm534_vm5 = vcmask 1041408  }
   0xd   : > { %v784_v2 = vld [vmem:[%s948_s1 + $0x78] sm:$0xff]  ;;  %380 = vmatpush.bf16.msra.mxu1 %v792_v1  ;;  %v783_v5 = vld [vmem:[%s948_s1 + $0x70] sm:$0xff]  ;;  %v782_v8 = vld [vmem:[%s948_s1 + $0x68] sm:$0xff]  ;;  %s200_s20 = scalar_lea.vmem %s947_s0, %s630_s10  ;;  %v395_v28 = vshrl.u32 %v394_v25, 7  ;;  %s206_s27 = scalar_lea.vmem %s950_s3, %s630_s10 }
   0xe   : > { %487 = vmatpush.bf16.msra.mxu2 %v784_v2  ;;  %v773_v9 = vld [vmem:[%s948_s1 + $0x20] sm:$0xff]  ;;  %v772_v12 = vld [vmem:[%s948_s1 + $0x18] sm:$0xff]  ;;  %v771_v15 = vld [vmem:[%s948_s1 + $0x10] sm:$0xff]  ;;  %s211_s30 = scalar_lea.vmem %s951_s4, %s633_s17 }
   0xf   : > { %v789_v10 = vld [vmem:[%s948_s1 + $0xa0] sm:$0xff]  ;;  %v788_v13 = vld [vmem:[%s948_s1 + $0x98] sm:$0xff]  ;;  %v787_v16 = vld [vmem:[%s948_s1 + $0x90] sm:$0xff]  ;;  %v401_v29 = vand.u32 15, %v395_v28  ;;  %v396_v30 = vadd.s32 8, %v395_v28  ;;  %vm425_vm0 = vcmp.lt.s32.totalorder %v395_v28, 1 }
  0x10   : > { %285 = vmatpush.bf16.msra.mxu0 %v775_v3  ;;  %v781_v11 = vld [vmem:[%s948_s1 + $0x60] sm:$0xff]  ;;  %v780_v14 = vld [vmem:[%s948_s1 + $0x58] sm:$0xff]  ;;  %v779_v17 = vld [vmem:[%s948_s1 + $0x50] sm:$0xff]  ;;  %vm434_vm2 = vcmp.lt.s32.totalorder %v395_v28, 7 }
  0x11   : > { %381 = vmatpush.bf16.msra.mxu1 %v791_v4  ;;  %v770_v18 = vld [vmem:[%s948_s1 + $0x8] sm:$0xff]  ;;  %v769_v21 = vld [vmem:[%s948_s1] sm:$0xff]  ;;  %vm421_vm1 = vcmp.eq.s32.totalorder %v401_v29, 0  ;;  %v408_v37 = vand.u32 15, %v396_v30 }
  0x12   : > { %488 = vmatpush.bf16.msra.mxu2 %v783_v5  ;;  %v786_v19 = vld [vmem:[%s948_s1 + $0x88] sm:$0xff]  ;;  %v785_v22 = vld [vmem:[%s948_s1 + $0x80] sm:$0xff] }
  0x13   : > { %v778_v20 = vld [vmem:[%s948_s1 + $0x48] sm:$0xff]  ;;  %v777_v23 = vld [vmem:[%s948_s1 + $0x40] sm:$0xff]  ;;  %vm431_vm3 = vcmp.eq.s32.totalorder %v408_v37, 15 }
  0x14   : > { %286 = vmatpush.bf16.msra.mxu0 %v774_v6  ;;  %v768_v24 = vld [vmem:[%s200_s20] sm:$0xff] }
  0x15   : > { %382 = vmatpush.bf16.msra.mxu1 %v790_v7  ;;  %v806_v48 = vld [vmem:[%s949_s2] ss:$0 sm:$0xff] }
  0x16   : > { %489 = vmatpush.bf16.msra.mxu2 %v782_v8 }
  0x18   : > { %287 = vmatpush.bf16.msra.mxu0 %v773_v9 }
  0x19   : > { %383 = vmatpush.bf16.msra.mxu1 %v789_v10 }
  0x1a   : > { %490 = vmatpush.bf16.msra.mxu2 %v781_v11 }
  0x1c   : > { %288 = vmatpush.bf16.msra.mxu0 %v772_v12 }
  0x1d   : > { %384 = vmatpush.bf16.msra.mxu1 %v788_v13 }
  0x1e   : > { %491 = vmatpush.bf16.msra.mxu2 %v780_v14 }
  0x20   : > { %289 = vmatpush.bf16.msra.mxu0 %v771_v15 }
  0x21   : > { %385 = vmatpush.bf16.msra.mxu1 %v787_v16 }
  0x22   : > { %492 = vmatpush.bf16.msra.mxu2 %v779_v17 }
  0x24   : > { %290 = vmatpush.bf16.msra.mxu0 %v770_v18 }
  0x25   : > { %386 = vmatpush.bf16.msra.mxu1 %v786_v19 }
  0x26   : > { %493 = vmatpush.bf16.msra.mxu2 %v778_v20 }
  0x28   : > { %291 = vmatpush.bf16.msra.mxu0 %v769_v21 }
  0x29   : > { %387 = vmatpush.bf16.msra.mxu1 %v785_v22 }
  0x2a   : > { %494 = vmatpush.bf16.msra.mxu2 %v777_v23 }
  0x2b   : > { %292 = vmatmul.bf16.vlgmr.msra.gmra.mxu0 %v768_v24 }
  0x2c   : > { %388 = vmatmul.bf16.vlgmr.msra.gmra.mxu1 %v768_v24 }
  0x2d   : > { %495 = vmatmul.bf16.vlgmr.msra.gmra.mxu2 %v768_v24 }
  0xa8   : > { %v293_v26 = vpop.f32.mrf.mxu0 }
  0xa9   : > { %v389_v27 = vpop.f32.mrf.mxu1  ;;  %v423_v34 = vrot.slane %v293_v26, 7 }
  0xaa   : > { %v432_v39 = vrot.slane %v389_v27, 1 }
  0xb0   : > { %v496_v31 = vpop.f32.mrf.mxu2  ;;  %v295_v32 = vpop.f32.mrf.mxu0 }
  0xb1   : > { %v391_v33 = vpop.f32.mrf.mxu1  ;;  %v424_v35 = vrot.slane %v295_v32, 7 }
  0xb2   : > { %v433_v36 = vrot.slane %v391_v33, 1 }
  0xb3   : > { %v427_v38 = vsel %vm425_vm0, %v424_v35, %v423_v34  ;;  %v426_v44 = vsel %vm425_vm0, %v423_v34, %v424_v35 }
  0xb4   : > { %v428_v40 = vsel %vm421_vm1, 0.0, %v427_v38  ;;  %v436_v42 = vsel %vm434_vm2, %v433_v36, %v432_v39  ;;  %v435_v43 = vsel %vm434_vm2, %v432_v39, %v433_v36 }
  0xb5   : > { %v497_v41 = vadd.f32 %v496_v31, %v428_v40  ;;  %v438_v49 = vsel %vm431_vm3, 0.0, %v436_v42 }
  0xb7   : > { %v501_v47 = vadd.f32 %v497_v41, %v435_v43 }
  0xb8   : > { %v498_v45 = vpop.f32.mrf.mxu2 }
  0xb9   : > { %v499_v46 = vadd.f32 %v498_v45, %v426_v44  ;;  %v507_v51 = vadd.f32 %v806_v48, %v501_v47 }
  0xbb   : > { %v502_v50 = vadd.f32 %v499_v46, %v438_v49 }
  0xbd   : > { %v508_v52 = vadd.f32 %v806_v48, %v502_v50 }
  0xbf   : > { %v796_v53 = vpack.c.bf16 %v508_v52, %v507_v51  ;;  %v513_v54 = vadd.f32 %v508_v52, %v507_v51 }
  0xc1   : > { %797 = vst [vmem:[%s206_s27] sm:$0xff] %v796_v53   ;;  %v514_v55 = vrot.slane %v513_v54, 4 }
  0xc3   : > { %v515_v56 = vadd.f32 %v514_v55, %v513_v54 }
  0xc5   : > { %v516_v57 = vrot.slane %v515_v56, 2 }
  0xc7   : > { %v517_v58 = vadd.f32 %v516_v57, %v515_v56 }
  0xc9   : > { %v518_v59 = vrot.slane %v517_v58, 1 }
  0xcb   : > { %v519_v60 = vadd.f32 %v518_v59, %v517_v58 }
  0xcd   : > { %v520_v61 = vmul.f32 0.0625, %v519_v60 }
  0xcf   : > { %v521_v62 = vsub.f32 %v507_v51, %v520_v61  ;;  %v522_v63 = vsub.f32 %v508_v52, %v520_v61 }
  0xd1   : > { %v523_v0 = vmul.f32 %v521_v62, %v521_v62  ;;  %v524_v1 = vmul.f32 %v522_v63, %v522_v63 }
  0xd3   : > { %v525_v2 = vadd.f32 %v524_v1, %v523_v0 }
  0xd5   : > { %v526_v3 = vrot.slane %v525_v2, 4 }
  0xd7   : > { %v527_v4 = vadd.f32 %v526_v3, %v525_v2 }
  0xd9   : > { %v528_v5 = vrot.slane %v527_v4, 2 }
  0xdb   : > { %v529_v6 = vadd.f32 %v528_v5, %v527_v4 }
  0xdd   : > { %v530_v7 = vrot.slane %v529_v6, 1 }
  0xdf   : > { %v531_v8 = vadd.f32 %v530_v7, %v529_v6 }
  0xe1   : > { %v533_v9 = vsel %vm532_vm4, %v519_v60, %v531_v8 }
  0xe2   : > { %v535_v10 = vsel %vm534_vm5, %v533_v9, 0.0 }
  0xe3   : > { %536 = vst [vmem:[%s211_s30] sm:$0xff] %v535_v10 }
  0xe4 PF: > { %s15_s15 = sadd.s32 1, %s813_s15  }
  0xe5   : > { %p12_p5 = scmp.ge.s32.totalorder %s15_s15, 4  }
  0xe7   :  { %14 = sbr.rel (!%p12_p5) target bundleno = 1 (0x1), region = 76 }

// kernel: upconv_forward.9
= control target key start
LH: loop header
LB: loop body
LE: loop exit
PB: predicated region body
PF: predicated region fallthrough
CT: control target
= control target key end

     0   :  { %s307_s12 = smov 0   ;;  %s330_s0 = inlined_call_operand.vmem [shape: bf16[32,128], index: 0, kind: input, shape index: {}]   ;;  %s331_s1 = inlined_call_operand.vmem [shape: f32[1,128], index: 1, kind: input, shape index: {}]   ;;  %s332_s2 = inlined_call_operand.vmem [shape: f32[1,128], index: 2, kind: input, shape index: {}]   ;;  %s333_s3 = inlined_call_operand.vmem [shape: f32[32,128], index: 3, kind: output, shape index: {}]  }
   0x1 LB: > { %s254_s13 = sadd.s32 4294967295, %s285_s12   ;;  %p258_p0 = scmp.ge.s32.totalorder %s285_s12, 1  ;;  %s285_s12 = sphi %s307_s12, %s13_s12  }
   0x2   : > { %p138_p1 = scmp.lt.s32.totalorder %s285_s12, 3 }
   0x4   : > { %p139_p2 = pnand %p258_p0, %p138_p1 }
   0x5   : > { %s259_s14 = sshll.u32 (!%p139_p2), %s254_s13, 1 }
   0x6   : > { %142 = sbr.rel (%p139_p2) target bundleno = 26 (0x1a), region = 32  ;;  %p163_p3 = scmp.lt.s32.totalorder (!%p139_p2), %s259_s14, 3 }
   0xb   : > { %s335_s14 = smov (!%p163_p3, %s259_s14), 3  ;;  %v277_v0 = vld [vmem:[%s331_s1] ss:$0 sm:$0xff] }
   0xc   : > { %s260_s15 = sshll.u32 %s335_s14, 2  ;;  %v278_v4 = vld [vmem:[%s332_s2] ss:$0 sm:$0xff]  ;;  %s262_s23 = sshll.u32 %s335_s14, 3 }
   0xd   : > { %s166_s18 = scalar_lea.vmem %s330_s0, %s260_s15  ;;  %s172_s26 = scalar_lea.vmem %s333_s3, %s262_s23 }
   0xe   : > { %v266_v1 = vld [vmem:[%s166_s18] sm:$0xff]  }
   0xf   : > { %v267_v2 = vunpack.c.l.bf16 %v266_v1  ;;  %v268_v3 = vunpack.c.h.bf16 %v266_v1 }
  0x11   : > { %v182_v5 = vmul.f32 %v277_v0, %v267_v2  ;;  %v183_v6 = vmul.f32 %v277_v0, %v268_v3 }
  0x13   : > { %v188_v7 = vadd.f32 %v278_v4, %v182_v5  ;;  %v189_v8 = vadd.f32 %v278_v4, %v183_v6 }
  0x15   : > { %vm190_vm0 = vcmp.gt.f32.partialorder %v188_v7, 0.0  ;;  %v192_v9 = vmul.f32 0.1, %v188_v7  ;;  %vm191_vm1 = vcmp.gt.f32.partialorder %v189_v8, 0.0  ;;  %v193_v10 = vmul.f32 0.1, %v189_v8 }
  0x17   : > { %v194_v11 = vsel %vm190_vm0, %v188_v7, %v192_v9  ;;  %v195_v12 = vsel %vm191_vm1, %v189_v8, %v193_v10 }
  0x18   : > { %196 = vst [vmem:[%s172_s26] sm:$0xff] %v194_v11 }
  0x19   : > { %197 = vst [vmem:[%s172_s26 + $0x8] sm:$0xff] %v195_v12 }
  0x1a PF: > { %s13_s12 = sadd.s32 1, %s285_s12  }
  0x1b   : > { %p10_p4 = scmp.ge.s32.totalorder %s13_s12, 4  }
  0x1d   :  { %12 = sbr.rel (!%p10_p4) target bundleno = 1 (0x1), region = 62 }

</bundles_post_ra>
